<compile_context>
chip_gen: v6e
topology: v6e:2x2x1
jax: 0.10.0
libtpu: 0.0.40
codegen_flags: <defaults>
</compile_context>

<pallas_src>
import jax
import jax.numpy as jnp
from jax.experimental import pallas as pl
from jax.experimental.pallas import tpu as pltpu


# ----------------------------------------------------------------------------
# Fused kernel: all layers, both directions, final Linear.
# ----------------------------------------------------------------------------
def _make_fused_kernel(T, Bp, H, num_layers):
    H4 = 4 * H
    H8 = 8 * H

    def kernel(*refs):
        # refs = [x2d] + [wih, whh_blk, b] * num_layers + [fcw, fcb] + [out]
        x2d_ref = refs[0]
        n_w = 3 * num_layers
        layer_refs = refs[1:1 + n_w]
        fcw_ref = refs[1 + n_w]          # (2H, O)  == fc.weight^T
        fcb_ref = refs[2 + n_w]          # (1, O)
        out_ref = refs[3 + n_w]          # (Bp, O)

        zeros = jnp.zeros((Bp, H), jnp.float32)

        def cell(gates, c_prev):
            # PyTorch gate order i, f, g, o over the (Bp, 4H) gate block.
            if H4 <= 128:
                # Wide form: one sigmoid + one tanh over a single vreg lane-width.
                sig = jax.nn.sigmoid(gates)
                tah = jnp.tanh(gates)
                i_g = sig[:, 0:H]
                f_g = sig[:, H:2 * H]
                g_g = tah[:, 2 * H:3 * H]
                o_g = sig[:, 3 * H:4 * H]
            else:
                # Per-gate form: avoid ~2x wasted EUP work once 4H > one vreg.
                i_g = jax.nn.sigmoid(gates[:, 0:H])
                f_g = jax.nn.sigmoid(gates[:, H:2 * H])
                g_g = jnp.tanh(gates[:, 2 * H:3 * H])
                o_g = jax.nn.sigmoid(gates[:, 3 * H:4 * H])
            c_new = f_g * c_prev + i_g * g_g
            h_new = o_g * jnp.tanh(c_new)
            return h_new, c_new

        h_f_last = zeros
        h_b_last = zeros
        act = x2d_ref[...]                       # (T*Bp, Din) for layer 0

        for layer in range(num_layers):
            wih_ref = layer_refs[3 * layer + 0]  # layer 0: (Din, 8H); else (2H, 8H)
            whh_ref = layer_refs[3 * layer + 1]  # (2H, 8H) block-diag [[Wf,0],[0,Wb]]
            b_ref = layer_refs[3 * layer + 2]    # (1, 8H) = [b_f | b_b], b_ih + b_hh
            is_last = layer == num_layers - 1

            # --- hoisted input projection: both directions in ONE batched matmul,
            #     bias folded in once.  Columns [0:4H] = forward, [4H:8H] = backward.
            xg = jnp.dot(act, wih_ref[...],
                         preferred_element_type=jnp.float32) + b_ref[...]

            whh_blk = whh_ref[...]               # load once, reused by all steps

            h_f, c_f = zeros, zeros
            h_b, c_b = zeros, zeros

            if is_last:
                # Backward half of out[:, -1, :] is the reverse direction's FIRST
                # step (t = T-1) with zero state: gates == hoisted projection.
                h_b_last, _ = cell(xg[(T - 1) * Bp:T * Bp, H4:H8], zeros)
                whh_f = whh_blk[0:H, 0:H4]       # forward block of the block-diag
                for s in range(T):               # fully unrolled: T is static
                    g_f = (xg[s * Bp:(s + 1) * Bp, 0:H4]
                           + jnp.dot(h_f, whh_f,
                                     preferred_element_type=jnp.float32))
                    h_f, c_f = cell(g_f, c_f)
                h_f_last = h_f
            else:
                hf_steps = [None] * T
                hb_steps = [None] * T
                for s in range(T):               # fully unrolled: T is static
                    t_f = s
                    t_b = T - 1 - s
                    # fused fwd+bwd recurrent matmul: (Bp,2H) x (2H,8H) block-diag
                    h_cat = jnp.concatenate([h_f, h_b], axis=1)
                    g_all = jnp.dot(h_cat, whh_blk,
                                    preferred_element_type=jnp.float32)
                    g_f = xg[t_f * Bp:(t_f + 1) * Bp, 0:H4] + g_all[:, 0:H4]
                    g_b = xg[t_b * Bp:(t_b + 1) * Bp, H4:H8] + g_all[:, H4:H8]
                    h_f, c_f = cell(g_f, c_f)
                    h_b, c_b = cell(g_b, c_b)
                    hf_steps[t_f] = h_f
                    hb_steps[t_b] = h_b
                # Assemble next layer's input once, off the recurrence chain:
                # (T*Bp, 2H) with [fwd | bwd] per timestep.  No scratch stores.
                act = jnp.concatenate(
                    [jnp.concatenate([hf_steps[t], hb_steps[t]], axis=1)
                     for t in range(T)], axis=0)

        # --- fused final Linear: concat([h_fwd(T-1), h_bwd(T-1)]) @ W^T + b,
        #     as two row-sliced matmuls (no in-kernel concat needed).
        out = (jnp.dot(h_f_last, fcw_ref[0:H, :],
                       preferred_element_type=jnp.float32)
               + jnp.dot(h_b_last, fcw_ref[H:2 * H, :],
                         preferred_element_type=jnp.float32)
               + fcb_ref[...])
        out_ref[...] = out.astype(out_ref.dtype)

    return kernel


def _full_block(arr):
    shape = arr.shape
    return pl.BlockSpec(shape, lambda _s=shape: (0,) * len(_s))


def improved_lstm_forward(x, params):
    """x: (B, T, input_size) batch_first (like the PyTorch module). -> (B, output)."""
    B, T, Din = x.shape
    H = params["hidden_size"]
    num_layers = len(params["layers"])
    O = params["fc_w_t"].shape[1]

    # Sublane-pad the batch so every per-timestep slice is (8,128)-tile aligned.
    Bp = max(8, ((B + 7) // 8) * 8)

    # sequence-major, batch-padded, flattened to (T*Bp, Din): one projection matmul.
    xs = jnp.transpose(x, (1, 0, 2)).astype(jnp.float32)        # (T, B, Din)
    xs = jnp.pad(xs, ((0, 0), (0, Bp - B), (0, 0)))             # (T, Bp, Din)
    x2d = xs.reshape(T * Bp, Din)

    inputs = [x2d]
    for layer in params["layers"]:
        inputs += [layer["wih"], layer["whh_blk"], layer["b"]]
    inputs += [params["fc_w_t"], params["fc_b"]]

    # Advisory cost estimate (hoisted projections + recurrence + FC).
    flops = 0
    din = Din
    for li in range(num_layers):
        flops += 2 * (T * Bp) * din * (8 * H)            # hoisted input projection
        if li < num_layers - 1:
            flops += 2 * T * Bp * (2 * H) * (8 * H)      # fused fwd+bwd recurrence
        else:
            flops += 2 * T * Bp * H * (4 * H)            # fwd-only recurrence
        din = 2 * H
    flops += 2 * Bp * (2 * H) * O                        # final Linear
    n_cells = (num_layers - 1) * 2 * T + T + 1
    transcendentals = n_cells * Bp * (2 * 4 * H + H)
    bytes_accessed = sum(int(a.size) * 4 for a in inputs) + Bp * O * 4

    kernel = _make_fused_kernel(T, Bp, H, num_layers)
    out_padded = pl.pallas_call(
        kernel,
        out_shape=jax.ShapeDtypeStruct((Bp, O), jnp.float32),
        in_specs=[_full_block(a) for a in inputs],
        out_specs=pl.BlockSpec((Bp, O), lambda: (0, 0)),
        compiler_params=pltpu.CompilerParams(
            vmem_limit_bytes=32 * 1024 * 1024),
        cost_estimate=pl.CostEstimate(
            flops=int(flops),
            transcendentals=int(transcendentals),
            bytes_accessed=int(bytes_accessed)),
    )(*inputs)
    return out_padded[:B]


# ----------------------------------------------------------------------------
# Parameter init (mirrors PyTorch uniform(-1/sqrt(H), 1/sqrt(H)))
# ----------------------------------------------------------------------------
def init_params(key, input_size, hidden_size, num_layers, output_size):
    H = hidden_size
    k = 1.0 / jnp.sqrt(jnp.float32(H))
    layers = []
    din = input_size
    zero_blk = jnp.zeros((H, 4 * H), jnp.float32)
    for _ in range(num_layers):
        key, k1, k2, k3, k4, k5, k6, k7, k8 = jax.random.split(key, 9)
        wih_f = jax.random.uniform(k1, (din, 4 * H), jnp.float32, -k, k)   # W_ih^T
        whh_f = jax.random.uniform(k2, (H, 4 * H), jnp.float32, -k, k)     # W_hh^T
        b_f = (jax.random.uniform(k3, (4 * H,), jnp.float32, -k, k)
               + jax.random.uniform(k4, (4 * H,), jnp.float32, -k, k))     # b_ih + b_hh
        wih_b = jax.random.uniform(k5, (din, 4 * H), jnp.float32, -k, k)
        whh_b = jax.random.uniform(k6, (H, 4 * H), jnp.float32, -k, k)
        b_b = (jax.random.uniform(k7, (4 * H,), jnp.float32, -k, k)
               + jax.random.uniform(k8, (4 * H,), jnp.float32, -k, k))
        whh_blk = jnp.concatenate(
            [jnp.concatenate([whh_f, zero_blk], axis=1),
             jnp.concatenate([zero_blk, whh_b], axis=1)], axis=0)          # (2H, 8H)
        layers.append({
            "wih": jnp.concatenate([wih_f, wih_b], axis=1),        # (din, 8H)
            "whh_blk": whh_blk,                                    # (2H, 8H)
            "b": jnp.concatenate([b_f, b_b]).reshape(1, 8 * H),    # (1, 8H)
        })
        din = 2 * H
    key, kf1, kf2 = jax.random.split(key, 3)
    kfc = 1.0 / jnp.sqrt(jnp.float32(2 * H))
    fc_w_t = jax.random.uniform(kf1, (2 * H, output_size), jnp.float32, -kfc, kfc)
    fc_b = jax.random.uniform(kf2, (1, output_size), jnp.float32, -kfc, kfc)
    return {"hidden_size": H, "layers": layers, "fc_w_t": fc_w_t, "fc_b": fc_b}


# ----------------------------------------------------------------------------
# Pure-JAX reference (PyTorch nn.LSTM semantics) for a correctness check.
# ----------------------------------------------------------------------------
def _reference_forward(x, params):
    B, T, _ = x.shape
    H = params["hidden_size"]
    hp = jax.lax.Precision.HIGHEST
    h = jnp.transpose(x, (1, 0, 2)).astype(jnp.float32)   # (T, B, Din)
    for layer in params["layers"]:
        wih = layer["wih"]
        bias = layer["b"][0]
        whh_blk = layer["whh_blk"]
        dirs = []
        for d in range(2):
            c0 = d * 4 * H
            wih_d = wih[:, c0:c0 + 4 * H]
            whh_d = whh_blk[d * H:(d + 1) * H, c0:c0 + 4 * H]
            b_d = bias[c0:c0 + 4 * H]
            xs = h if d == 0 else h[::-1]

            def step(carry, x_t, wih_d=wih_d, whh_d=whh_d, b_d=b_d):
                h_prev, c_prev = carry
                g = (jnp.dot(x_t, wih_d, precision=hp)
                     + jnp.dot(h_prev, whh_d, precision=hp) + b_d)
                i = jax.nn.sigmoid(g[:, 0:H])
                f = jax.nn.sigmoid(g[:, H:2 * H])
                gg = jnp.tanh(g[:, 2 * H:3 * H])
                o = jax.nn.sigmoid(g[:, 3 * H:4 * H])
                c = f * c_prev + i * gg
                hn = o * jnp.tanh(c)
                return (hn, c), hn

            init = (jnp.zeros((B, H), jnp.float32), jnp.zeros((B, H), jnp.float32))
            _, ys = jax.lax.scan(step, init, xs)
            dirs.append(ys if d == 0 else ys[::-1])
        h = jnp.concatenate(dirs, axis=-1)
    last = h[T - 1]
    return jnp.dot(last, params["fc_w_t"], precision=hp) + params["fc_b"]


if __name__ == "__main__":
    input_size, hidden_size, num_layers, output_size = 16, 32, 2, 4
    batch, seq = 2, 8

    key = jax.random.PRNGKey(0)
    key, kx = jax.random.split(key)
    x = jax.random.normal(kx, (batch, seq, input_size), jnp.float32)
    params = init_params(key, input_size, hidden_size, num_layers, output_size)

    out = improved_lstm_forward(x, params)
    out = jax.block_until_ready(out)
    assert out.shape == (batch, output_size), out.shape
    assert bool(jnp.all(jnp.isfinite(out)))

    ref = _reference_forward(x, params)
    max_err = float(jnp.max(jnp.abs(out - ref)))
    assert max_err < 1e-2, f"kernel vs reference max abs error {max_err}"

    print("KERNEL_OK")
</pallas_src>

<mosaic_0001>
module attributes {stable_mosaic.version = 11 : i64} {
  func.func @kernel(%arg0: memref<64x16xf32, #tpu.memory_space<vmem>>, %arg1: memref<16x256xf32, #tpu.memory_space<vmem>>, %arg2: memref<64x256xf32, #tpu.memory_space<vmem>>, %arg3: memref<1x256xf32, #tpu.memory_space<vmem>>, %arg4: memref<64x256xf32, #tpu.memory_space<vmem>>, %arg5: memref<64x256xf32, #tpu.memory_space<vmem>>, %arg6: memref<1x256xf32, #tpu.memory_space<vmem>>, %arg7: memref<64x4xf32, #tpu.memory_space<vmem>>, %arg8: memref<1x4xf32, #tpu.memory_space<vmem>>, %arg9: memref<8x4xf32, #tpu.memory_space<vmem>>) attributes {dimension_semantics = [], scalar_prefetch = 0 : i64, scratch_operands = 0 : i64, tpu.core_type = #tpu.core_type<tc>} {
    %cst = arith.constant 0.000000e+00 : f32
    %0 = vector.broadcast %cst : f32 to vector<8x32xf32>
    %c0 = arith.constant 0 : index
    %c0_0 = arith.constant 0 : index
    %1 = vector.load %arg0[%c0, %c0_0] : memref<64x16xf32, #tpu.memory_space<vmem>>, vector<64x16xf32>
    %c0_1 = arith.constant 0 : index
    %c0_2 = arith.constant 0 : index
    %2 = vector.load %arg1[%c0_1, %c0_2] : memref<16x256xf32, #tpu.memory_space<vmem>>, vector<16x256xf32>
    %cst_3 = arith.constant dense<0.000000e+00> : vector<64x256xf32>
    %3 = tpu.matmul %1, %2, %cst_3 {dimension_numbers = #tpu.dot_dimension_numbers<[1], [0], [0], [1], [0, 0, 1, 1], [], []>} : vector<64x16xf32>, vector<16x256xf32>, vector<64x256xf32> -> vector<64x256xf32>
    %c0_4 = arith.constant 0 : index
    %c0_5 = arith.constant 0 : index
    %4 = vector.load %arg3[%c0_4, %c0_5] : memref<1x256xf32, #tpu.memory_space<vmem>>, vector<1x256xf32>
    %5 = vector.broadcast %4 : vector<1x256xf32> to vector<64x256xf32>
    %6 = arith.addf %3, %5 : vector<64x256xf32>
    %c0_6 = arith.constant 0 : index
    %c0_7 = arith.constant 0 : index
    %7 = vector.load %arg2[%c0_6, %c0_7] : memref<64x256xf32, #tpu.memory_space<vmem>>, vector<64x256xf32>
    %8 = tpu.concatenate %0, %0 in 1 : vector<8x32xf32>, vector<8x32xf32> -> vector<8x64xf32>
    %cst_8 = arith.constant dense<0.000000e+00> : vector<8x256xf32>
    %9 = tpu.matmul %8, %7, %cst_8 {dimension_numbers = #tpu.dot_dimension_numbers<[1], [0], [0], [1], [0, 0, 1, 1], [], []>} : vector<8x64xf32>, vector<64x256xf32>, vector<8x256xf32> -> vector<8x256xf32>
    %10 = vector.extract_strided_slice %6 {offsets = [0, 0], sizes = [8, 128], strides = [1, 1]} : vector<64x256xf32> to vector<8x128xf32>
    %11 = vector.extract_strided_slice %9 {offsets = [0, 0], sizes = [8, 128], strides = [1, 1]} : vector<8x256xf32> to vector<8x128xf32>
    %12 = arith.addf %10, %11 : vector<8x128xf32>
    %13 = vector.extract_strided_slice %6 {offsets = [56, 128], sizes = [8, 128], strides = [1, 1]} : vector<64x256xf32> to vector<8x128xf32>
    %14 = vector.extract_strided_slice %9 {offsets = [0, 128], sizes = [8, 128], strides = [1, 1]} : vector<8x256xf32> to vector<8x128xf32>
    %15 = arith.addf %13, %14 : vector<8x128xf32>
    %16 = arith.negf %12 : vector<8x128xf32>
    %17 = math.exp %16 : vector<8x128xf32>
    %cst_9 = arith.constant 1.000000e+00 : f32
    %18 = vector.broadcast %cst_9 : f32 to vector<8x128xf32>
    %19 = arith.addf %18, %17 : vector<8x128xf32>
    %20 = arith.divf %18, %19 : vector<8x128xf32>
    %21 = math.tanh %12 : vector<8x128xf32>
    %22 = vector.extract_strided_slice %20 {offsets = [0, 0], sizes = [8, 32], strides = [1, 1]} : vector<8x128xf32> to vector<8x32xf32>
    %23 = vector.extract_strided_slice %20 {offsets = [0, 32], sizes = [8, 32], strides = [1, 1]} : vector<8x128xf32> to vector<8x32xf32>
    %24 = vector.extract_strided_slice %21 {offsets = [0, 64], sizes = [8, 32], strides = [1, 1]} : vector<8x128xf32> to vector<8x32xf32>
    %25 = vector.extract_strided_slice %20 {offsets = [0, 96], sizes = [8, 32], strides = [1, 1]} : vector<8x128xf32> to vector<8x32xf32>
    %26 = arith.mulf %23, %0 : vector<8x32xf32>
    %27 = arith.mulf %22, %24 : vector<8x32xf32>
    %28 = arith.addf %26, %27 : vector<8x32xf32>
    %29 = math.tanh %28 : vector<8x32xf32>
    %30 = arith.mulf %25, %29 : vector<8x32xf32>
    %31 = arith.negf %15 : vector<8x128xf32>
    %32 = math.exp %31 : vector<8x128xf32>
    %cst_10 = arith.constant 1.000000e+00 : f32
    %33 = vector.broadcast %cst_10 : f32 to vector<8x128xf32>
    %34 = arith.addf %33, %32 : vector<8x128xf32>
    %35 = arith.divf %33, %34 : vector<8x128xf32>
    %36 = math.tanh %15 : vector<8x128xf32>
    %37 = vector.extract_strided_slice %35 {offsets = [0, 0], sizes = [8, 32], strides = [1, 1]} : vector<8x128xf32> to vector<8x32xf32>
    %38 = vector.extract_strided_slice %35 {offsets = [0, 32], sizes = [8, 32], strides = [1, 1]} : vector<8x128xf32> to vector<8x32xf32>
    %39 = vector.extract_strided_slice %36 {offsets = [0, 64], sizes = [8, 32], strides = [1, 1]} : vector<8x128xf32> to vector<8x32xf32>
    %40 = vector.extract_strided_slice %35 {offsets = [0, 96], sizes = [8, 32], strides = [1, 1]} : vector<8x128xf32> to vector<8x32xf32>
    %41 = arith.mulf %38, %0 : vector<8x32xf32>
    %42 = arith.mulf %37, %39 : vector<8x32xf32>
    %43 = arith.addf %41, %42 : vector<8x32xf32>
    %44 = math.tanh %43 : vector<8x32xf32>
    %45 = arith.mulf %40, %44 : vector<8x32xf32>
    %46 = tpu.concatenate %30, %45 in 1 : vector<8x32xf32>, vector<8x32xf32> -> vector<8x64xf32>
    %cst_11 = arith.constant dense<0.000000e+00> : vector<8x256xf32>
    %47 = tpu.matmul %46, %7, %cst_11 {dimension_numbers = #tpu.dot_dimension_numbers<[1], [0], [0], [1], [0, 0, 1, 1], [], []>} : vector<8x64xf32>, vector<64x256xf32>, vector<8x256xf32> -> vector<8x256xf32>
    %48 = vector.extract_strided_slice %6 {offsets = [8, 0], sizes = [8, 128], strides = [1, 1]} : vector<64x256xf32> to vector<8x128xf32>
    %49 = vector.extract_strided_slice %47 {offsets = [0, 0], sizes = [8, 128], strides = [1, 1]} : vector<8x256xf32> to vector<8x128xf32>
    %50 = arith.addf %48, %49 : vector<8x128xf32>
    %51 = vector.extract_strided_slice %6 {offsets = [48, 128], sizes = [8, 128], strides = [1, 1]} : vector<64x256xf32> to vector<8x128xf32>
    %52 = vector.extract_strided_slice %47 {offsets = [0, 128], sizes = [8, 128], strides = [1, 1]} : vector<8x256xf32> to vector<8x128xf32>
    %53 = arith.addf %51, %52 : vector<8x128xf32>
    %54 = arith.negf %50 : vector<8x128xf32>
    %55 = math.exp %54 : vector<8x128xf32>
    %cst_12 = arith.constant 1.000000e+00 : f32
    %56 = vector.broadcast %cst_12 : f32 to vector<8x128xf32>
    %57 = arith.addf %56, %55 : vector<8x128xf32>
    %58 = arith.divf %56, %57 : vector<8x128xf32>
    %59 = math.tanh %50 : vector<8x128xf32>
    %60 = vector.extract_strided_slice %58 {offsets = [0, 0], sizes = [8, 32], strides = [1, 1]} : vector<8x128xf32> to vector<8x32xf32>
    %61 = vector.extract_strided_slice %58 {offsets = [0, 32], sizes = [8, 32], strides = [1, 1]} : vector<8x128xf32> to vector<8x32xf32>
    %62 = vector.extract_strided_slice %59 {offsets = [0, 64], sizes = [8, 32], strides = [1, 1]} : vector<8x128xf32> to vector<8x32xf32>
    %63 = vector.extract_strided_slice %58 {offsets = [0, 96], sizes = [8, 32], strides = [1, 1]} : vector<8x128xf32> to vector<8x32xf32>
    %64 = arith.mulf %61, %28 : vector<8x32xf32>
    %65 = arith.mulf %60, %62 : vector<8x32xf32>
    %66 = arith.addf %64, %65 : vector<8x32xf32>
    %67 = math.tanh %66 : vector<8x32xf32>
    %68 = arith.mulf %63, %67 : vector<8x32xf32>
    %69 = arith.negf %53 : vector<8x128xf32>
    %70 = math.exp %69 : vector<8x128xf32>
    %cst_13 = arith.constant 1.000000e+00 : f32
    %71 = vector.broadcast %cst_13 : f32 to vector<8x128xf32>
    %72 = arith.addf %71, %70 : vector<8x128xf32>
    %73 = arith.divf %71, %72 : vector<8x128xf32>
    %74 = math.tanh %53 : vector<8x128xf32>
    %75 = vector.extract_strided_slice %73 {offsets = [0, 0], sizes = [8, 32], strides = [1, 1]} : vector<8x128xf32> to vector<8x32xf32>
    %76 = vector.extract_strided_slice %73 {offsets = [0, 32], sizes = [8, 32], strides = [1, 1]} : vector<8x128xf32> to vector<8x32xf32>
    %77 = vector.extract_strided_slice %74 {offsets = [0, 64], sizes = [8, 32], strides = [1, 1]} : vector<8x128xf32> to vector<8x32xf32>
    %78 = vector.extract_strided_slice %73 {offsets = [0, 96], sizes = [8, 32], strides = [1, 1]} : vector<8x128xf32> to vector<8x32xf32>
    %79 = arith.mulf %76, %43 : vector<8x32xf32>
    %80 = arith.mulf %75, %77 : vector<8x32xf32>
    %81 = arith.addf %79, %80 : vector<8x32xf32>
    %82 = math.tanh %81 : vector<8x32xf32>
    %83 = arith.mulf %78, %82 : vector<8x32xf32>
    %84 = tpu.concatenate %68, %83 in 1 : vector<8x32xf32>, vector<8x32xf32> -> vector<8x64xf32>
    %cst_14 = arith.constant dense<0.000000e+00> : vector<8x256xf32>
    %85 = tpu.matmul %84, %7, %cst_14 {dimension_numbers = #tpu.dot_dimension_numbers<[1], [0], [0], [1], [0, 0, 1, 1], [], []>} : vector<8x64xf32>, vector<64x256xf32>, vector<8x256xf32> -> vector<8x256xf32>
    %86 = vector.extract_strided_slice %6 {offsets = [16, 0], sizes = [8, 128], strides = [1, 1]} : vector<64x256xf32> to vector<8x128xf32>
    %87 = vector.extract_strided_slice %85 {offsets = [0, 0], sizes = [8, 128], strides = [1, 1]} : vector<8x256xf32> to vector<8x128xf32>
    %88 = arith.addf %86, %87 : vector<8x128xf32>
    %89 = vector.extract_strided_slice %6 {offsets = [40, 128], sizes = [8, 128], strides = [1, 1]} : vector<64x256xf32> to vector<8x128xf32>
    %90 = vector.extract_strided_slice %85 {offsets = [0, 128], sizes = [8, 128], strides = [1, 1]} : vector<8x256xf32> to vector<8x128xf32>
    %91 = arith.addf %89, %90 : vector<8x128xf32>
    %92 = arith.negf %88 : vector<8x128xf32>
    %93 = math.exp %92 : vector<8x128xf32>
    %cst_15 = arith.constant 1.000000e+00 : f32
    %94 = vector.broadcast %cst_15 : f32 to vector<8x128xf32>
    %95 = arith.addf %94, %93 : vector<8x128xf32>
    %96 = arith.divf %94, %95 : vector<8x128xf32>
    %97 = math.tanh %88 : vector<8x128xf32>
    %98 = vector.extract_strided_slice %96 {offsets = [0, 0], sizes = [8, 32], strides = [1, 1]} : vector<8x128xf32> to vector<8x32xf32>
    %99 = vector.extract_strided_slice %96 {offsets = [0, 32], sizes = [8, 32], strides = [1, 1]} : vector<8x128xf32> to vector<8x32xf32>
    %100 = vector.extract_strided_slice %97 {offsets = [0, 64], sizes = [8, 32], strides = [1, 1]} : vector<8x128xf32> to vector<8x32xf32>
    %101 = vector.extract_strided_slice %96 {offsets = [0, 96], sizes = [8, 32], strides = [1, 1]} : vector<8x128xf32> to vector<8x32xf32>
    %102 = arith.mulf %99, %66 : vector<8x32xf32>
    %103 = arith.mulf %98, %100 : vector<8x32xf32>
    %104 = arith.addf %102, %103 : vector<8x32xf32>
    %105 = math.tanh %104 : vector<8x32xf32>
    %106 = arith.mulf %101, %105 : vector<8x32xf32>
    %107 = arith.negf %91 : vector<8x128xf32>
    %108 = math.exp %107 : vector<8x128xf32>
    %cst_16 = arith.constant 1.000000e+00 : f32
    %109 = vector.broadcast %cst_16 : f32 to vector<8x128xf32>
    %110 = arith.addf %109, %108 : vector<8x128xf32>
    %111 = arith.divf %109, %110 : vector<8x128xf32>
    %112 = math.tanh %91 : vector<8x128xf32>
    %113 = vector.extract_strided_slice %111 {offsets = [0, 0], sizes = [8, 32], strides = [1, 1]} : vector<8x128xf32> to vector<8x32xf32>
    %114 = vector.extract_strided_slice %111 {offsets = [0, 32], sizes = [8, 32], strides = [1, 1]} : vector<8x128xf32> to vector<8x32xf32>
    %115 = vector.extract_strided_slice %112 {offsets = [0, 64], sizes = [8, 32], strides = [1, 1]} : vector<8x128xf32> to vector<8x32xf32>
    %116 = vector.extract_strided_slice %111 {offsets = [0, 96], sizes = [8, 32], strides = [1, 1]} : vector<8x128xf32> to vector<8x32xf32>
    %117 = arith.mulf %114, %81 : vector<8x32xf32>
    %118 = arith.mulf %113, %115 : vector<8x32xf32>
    %119 = arith.addf %117, %118 : vector<8x32xf32>
    %120 = math.tanh %119 : vector<8x32xf32>
    %121 = arith.mulf %116, %120 : vector<8x32xf32>
    %122 = tpu.concatenate %106, %121 in 1 : vector<8x32xf32>, vector<8x32xf32> -> vector<8x64xf32>
    %cst_17 = arith.constant dense<0.000000e+00> : vector<8x256xf32>
    %123 = tpu.matmul %122, %7, %cst_17 {dimension_numbers = #tpu.dot_dimension_numbers<[1], [0], [0], [1], [0, 0, 1, 1], [], []>} : vector<8x64xf32>, vector<64x256xf32>, vector<8x256xf32> -> vector<8x256xf32>
    %124 = vector.extract_strided_slice %6 {offsets = [24, 0], sizes = [8, 128], strides = [1, 1]} : vector<64x256xf32> to vector<8x128xf32>
    %125 = vector.extract_strided_slice %123 {offsets = [0, 0], sizes = [8, 128], strides = [1, 1]} : vector<8x256xf32> to vector<8x128xf32>
    %126 = arith.addf %124, %125 : vector<8x128xf32>
    %127 = vector.extract_strided_slice %6 {offsets = [32, 128], sizes = [8, 128], strides = [1, 1]} : vector<64x256xf32> to vector<8x128xf32>
    %128 = vector.extract_strided_slice %123 {offsets = [0, 128], sizes = [8, 128], strides = [1, 1]} : vector<8x256xf32> to vector<8x128xf32>
    %129 = arith.addf %127, %128 : vector<8x128xf32>
    %130 = arith.negf %126 : vector<8x128xf32>
    %131 = math.exp %130 : vector<8x128xf32>
    %cst_18 = arith.constant 1.000000e+00 : f32
    %132 = vector.broadcast %cst_18 : f32 to vector<8x128xf32>
    %133 = arith.addf %132, %131 : vector<8x128xf32>
    %134 = arith.divf %132, %133 : vector<8x128xf32>
    %135 = math.tanh %126 : vector<8x128xf32>
    %136 = vector.extract_strided_slice %134 {offsets = [0, 0], sizes = [8, 32], strides = [1, 1]} : vector<8x128xf32> to vector<8x32xf32>
    %137 = vector.extract_strided_slice %134 {offsets = [0, 32], sizes = [8, 32], strides = [1, 1]} : vector<8x128xf32> to vector<8x32xf32>
    %138 = vector.extract_strided_slice %135 {offsets = [0, 64], sizes = [8, 32], strides = [1, 1]} : vector<8x128xf32> to vector<8x32xf32>
    %139 = vector.extract_strided_slice %134 {offsets = [0, 96], sizes = [8, 32], strides = [1, 1]} : vector<8x128xf32> to vector<8x32xf32>
    %140 = arith.mulf %137, %104 : vector<8x32xf32>
    %141 = arith.mulf %136, %138 : vector<8x32xf32>
    %142 = arith.addf %140, %141 : vector<8x32xf32>
    %143 = math.tanh %142 : vector<8x32xf32>
    %144 = arith.mulf %139, %143 : vector<8x32xf32>
    %145 = arith.negf %129 : vector<8x128xf32>
    %146 = math.exp %145 : vector<8x128xf32>
    %cst_19 = arith.constant 1.000000e+00 : f32
    %147 = vector.broadcast %cst_19 : f32 to vector<8x128xf32>
    %148 = arith.addf %147, %146 : vector<8x128xf32>
    %149 = arith.divf %147, %148 : vector<8x128xf32>
    %150 = math.tanh %129 : vector<8x128xf32>
    %151 = vector.extract_strided_slice %149 {offsets = [0, 0], sizes = [8, 32], strides = [1, 1]} : vector<8x128xf32> to vector<8x32xf32>
    %152 = vector.extract_strided_slice %149 {offsets = [0, 32], sizes = [8, 32], strides = [1, 1]} : vector<8x128xf32> to vector<8x32xf32>
    %153 = vector.extract_strided_slice %150 {offsets = [0, 64], sizes = [8, 32], strides = [1, 1]} : vector<8x128xf32> to vector<8x32xf32>
    %154 = vector.extract_strided_slice %149 {offsets = [0, 96], sizes = [8, 32], strides = [1, 1]} : vector<8x128xf32> to vector<8x32xf32>
    %155 = arith.mulf %152, %119 : vector<8x32xf32>
    %156 = arith.mulf %151, %153 : vector<8x32xf32>
    %157 = arith.addf %155, %156 : vector<8x32xf32>
    %158 = math.tanh %157 : vector<8x32xf32>
    %159 = arith.mulf %154, %158 : vector<8x32xf32>
    %160 = tpu.concatenate %144, %159 in 1 : vector<8x32xf32>, vector<8x32xf32> -> vector<8x64xf32>
    %cst_20 = arith.constant dense<0.000000e+00> : vector<8x256xf32>
    %161 = tpu.matmul %160, %7, %cst_20 {dimension_numbers = #tpu.dot_dimension_numbers<[1], [0], [0], [1], [0, 0, 1, 1], [], []>} : vector<8x64xf32>, vector<64x256xf32>, vector<8x256xf32> -> vector<8x256xf32>
    %162 = vector.extract_strided_slice %6 {offsets = [32, 0], sizes = [8, 128], strides = [1, 1]} : vector<64x256xf32> to vector<8x128xf32>
    %163 = vector.extract_strided_slice %161 {offsets = [0, 0], sizes = [8, 128], strides = [1, 1]} : vector<8x256xf32> to vector<8x128xf32>
    %164 = arith.addf %162, %163 : vector<8x128xf32>
    %165 = vector.extract_strided_slice %6 {offsets = [24, 128], sizes = [8, 128], strides = [1, 1]} : vector<64x256xf32> to vector<8x128xf32>
    %166 = vector.extract_strided_slice %161 {offsets = [0, 128], sizes = [8, 128], strides = [1, 1]} : vector<8x256xf32> to vector<8x128xf32>
    %167 = arith.addf %165, %166 : vector<8x128xf32>
    %168 = arith.negf %164 : vector<8x128xf32>
    %169 = math.exp %168 : vector<8x128xf32>
    %cst_21 = arith.constant 1.000000e+00 : f32
    %170 = vector.broadcast %cst_21 : f32 to vector<8x128xf32>
    %171 = arith.addf %170, %169 : vector<8x128xf32>
    %172 = arith.divf %170, %171 : vector<8x128xf32>
    %173 = math.tanh %164 : vector<8x128xf32>
    %174 = vector.extract_strided_slice %172 {offsets = [0, 0], sizes = [8, 32], strides = [1, 1]} : vector<8x128xf32> to vector<8x32xf32>
    %175 = vector.extract_strided_slice %172 {offsets = [0, 32], sizes = [8, 32], strides = [1, 1]} : vector<8x128xf32> to vector<8x32xf32>
    %176 = vector.extract_strided_slice %173 {offsets = [0, 64], sizes = [8, 32], strides = [1, 1]} : vector<8x128xf32> to vector<8x32xf32>
    %177 = vector.extract_strided_slice %172 {offsets = [0, 96], sizes = [8, 32], strides = [1, 1]} : vector<8x128xf32> to vector<8x32xf32>
    %178 = arith.mulf %175, %142 : vector<8x32xf32>
    %179 = arith.mulf %174, %176 : vector<8x32xf32>
    %180 = arith.addf %178, %179 : vector<8x32xf32>
    %181 = math.tanh %180 : vector<8x32xf32>
    %182 = arith.mulf %177, %181 : vector<8x32xf32>
    %183 = arith.negf %167 : vector<8x128xf32>
    %184 = math.exp %183 : vector<8x128xf32>
    %cst_22 = arith.constant 1.000000e+00 : f32
    %185 = vector.broadcast %cst_22 : f32 to vector<8x128xf32>
    %186 = arith.addf %185, %184 : vector<8x128xf32>
    %187 = arith.divf %185, %186 : vector<8x128xf32>
    %188 = math.tanh %167 : vector<8x128xf32>
    %189 = vector.extract_strided_slice %187 {offsets = [0, 0], sizes = [8, 32], strides = [1, 1]} : vector<8x128xf32> to vector<8x32xf32>
    %190 = vector.extract_strided_slice %187 {offsets = [0, 32], sizes = [8, 32], strides = [1, 1]} : vector<8x128xf32> to vector<8x32xf32>
    %191 = vector.extract_strided_slice %188 {offsets = [0, 64], sizes = [8, 32], strides = [1, 1]} : vector<8x128xf32> to vector<8x32xf32>
    %192 = vector.extract_strided_slice %187 {offsets = [0, 96], sizes = [8, 32], strides = [1, 1]} : vector<8x128xf32> to vector<8x32xf32>
    %193 = arith.mulf %190, %157 : vector<8x32xf32>
    %194 = arith.mulf %189, %191 : vector<8x32xf32>
    %195 = arith.addf %193, %194 : vector<8x32xf32>
    %196 = math.tanh %195 : vector<8x32xf32>
    %197 = arith.mulf %192, %196 : vector<8x32xf32>
    %198 = tpu.concatenate %182, %197 in 1 : vector<8x32xf32>, vector<8x32xf32> -> vector<8x64xf32>
    %cst_23 = arith.constant dense<0.000000e+00> : vector<8x256xf32>
    %199 = tpu.matmul %198, %7, %cst_23 {dimension_numbers = #tpu.dot_dimension_numbers<[1], [0], [0], [1], [0, 0, 1, 1], [], []>} : vector<8x64xf32>, vector<64x256xf32>, vector<8x256xf32> -> vector<8x256xf32>
    %200 = vector.extract_strided_slice %6 {offsets = [40, 0], sizes = [8, 128], strides = [1, 1]} : vector<64x256xf32> to vector<8x128xf32>
    %201 = vector.extract_strided_slice %199 {offsets = [0, 0], sizes = [8, 128], strides = [1, 1]} : vector<8x256xf32> to vector<8x128xf32>
    %202 = arith.addf %200, %201 : vector<8x128xf32>
    %203 = vector.extract_strided_slice %6 {offsets = [16, 128], sizes = [8, 128], strides = [1, 1]} : vector<64x256xf32> to vector<8x128xf32>
    %204 = vector.extract_strided_slice %199 {offsets = [0, 128], sizes = [8, 128], strides = [1, 1]} : vector<8x256xf32> to vector<8x128xf32>
    %205 = arith.addf %203, %204 : vector<8x128xf32>
    %206 = arith.negf %202 : vector<8x128xf32>
    %207 = math.exp %206 : vector<8x128xf32>
    %cst_24 = arith.constant 1.000000e+00 : f32
    %208 = vector.broadcast %cst_24 : f32 to vector<8x128xf32>
    %209 = arith.addf %208, %207 : vector<8x128xf32>
    %210 = arith.divf %208, %209 : vector<8x128xf32>
    %211 = math.tanh %202 : vector<8x128xf32>
    %212 = vector.extract_strided_slice %210 {offsets = [0, 0], sizes = [8, 32], strides = [1, 1]} : vector<8x128xf32> to vector<8x32xf32>
    %213 = vector.extract_strided_slice %210 {offsets = [0, 32], sizes = [8, 32], strides = [1, 1]} : vector<8x128xf32> to vector<8x32xf32>
    %214 = vector.extract_strided_slice %211 {offsets = [0, 64], sizes = [8, 32], strides = [1, 1]} : vector<8x128xf32> to vector<8x32xf32>
    %215 = vector.extract_strided_slice %210 {offsets = [0, 96], sizes = [8, 32], strides = [1, 1]} : vector<8x128xf32> to vector<8x32xf32>
    %216 = arith.mulf %213, %180 : vector<8x32xf32>
    %217 = arith.mulf %212, %214 : vector<8x32xf32>
    %218 = arith.addf %216, %217 : vector<8x32xf32>
    %219 = math.tanh %218 : vector<8x32xf32>
    %220 = arith.mulf %215, %219 : vector<8x32xf32>
    %221 = arith.negf %205 : vector<8x128xf32>
    %222 = math.exp %221 : vector<8x128xf32>
    %cst_25 = arith.constant 1.000000e+00 : f32
    %223 = vector.broadcast %cst_25 : f32 to vector<8x128xf32>
    %224 = arith.addf %223, %222 : vector<8x128xf32>
    %225 = arith.divf %223, %224 : vector<8x128xf32>
    %226 = math.tanh %205 : vector<8x128xf32>
    %227 = vector.extract_strided_slice %225 {offsets = [0, 0], sizes = [8, 32], strides = [1, 1]} : vector<8x128xf32> to vector<8x32xf32>
    %228 = vector.extract_strided_slice %225 {offsets = [0, 32], sizes = [8, 32], strides = [1, 1]} : vector<8x128xf32> to vector<8x32xf32>
    %229 = vector.extract_strided_slice %226 {offsets = [0, 64], sizes = [8, 32], strides = [1, 1]} : vector<8x128xf32> to vector<8x32xf32>
    %230 = vector.extract_strided_slice %225 {offsets = [0, 96], sizes = [8, 32], strides = [1, 1]} : vector<8x128xf32> to vector<8x32xf32>
    %231 = arith.mulf %228, %195 : vector<8x32xf32>
    %232 = arith.mulf %227, %229 : vector<8x32xf32>
    %233 = arith.addf %231, %232 : vector<8x32xf32>
    %234 = math.tanh %233 : vector<8x32xf32>
    %235 = arith.mulf %230, %234 : vector<8x32xf32>
    %236 = tpu.concatenate %220, %235 in 1 : vector<8x32xf32>, vector<8x32xf32> -> vector<8x64xf32>
    %cst_26 = arith.constant dense<0.000000e+00> : vector<8x256xf32>
    %237 = tpu.matmul %236, %7, %cst_26 {dimension_numbers = #tpu.dot_dimension_numbers<[1], [0], [0], [1], [0, 0, 1, 1], [], []>} : vector<8x64xf32>, vector<64x256xf32>, vector<8x256xf32> -> vector<8x256xf32>
    %238 = vector.extract_strided_slice %6 {offsets = [48, 0], sizes = [8, 128], strides = [1, 1]} : vector<64x256xf32> to vector<8x128xf32>
    %239 = vector.extract_strided_slice %237 {offsets = [0, 0], sizes = [8, 128], strides = [1, 1]} : vector<8x256xf32> to vector<8x128xf32>
    %240 = arith.addf %238, %239 : vector<8x128xf32>
    %241 = vector.extract_strided_slice %6 {offsets = [8, 128], sizes = [8, 128], strides = [1, 1]} : vector<64x256xf32> to vector<8x128xf32>
    %242 = vector.extract_strided_slice %237 {offsets = [0, 128], sizes = [8, 128], strides = [1, 1]} : vector<8x256xf32> to vector<8x128xf32>
    %243 = arith.addf %241, %242 : vector<8x128xf32>
    %244 = arith.negf %240 : vector<8x128xf32>
    %245 = math.exp %244 : vector<8x128xf32>
    %cst_27 = arith.constant 1.000000e+00 : f32
    %246 = vector.broadcast %cst_27 : f32 to vector<8x128xf32>
    %247 = arith.addf %246, %245 : vector<8x128xf32>
    %248 = arith.divf %246, %247 : vector<8x128xf32>
    %249 = math.tanh %240 : vector<8x128xf32>
    %250 = vector.extract_strided_slice %248 {offsets = [0, 0], sizes = [8, 32], strides = [1, 1]} : vector<8x128xf32> to vector<8x32xf32>
    %251 = vector.extract_strided_slice %248 {offsets = [0, 32], sizes = [8, 32], strides = [1, 1]} : vector<8x128xf32> to vector<8x32xf32>
    %252 = vector.extract_strided_slice %249 {offsets = [0, 64], sizes = [8, 32], strides = [1, 1]} : vector<8x128xf32> to vector<8x32xf32>
    %253 = vector.extract_strided_slice %248 {offsets = [0, 96], sizes = [8, 32], strides = [1, 1]} : vector<8x128xf32> to vector<8x32xf32>
    %254 = arith.mulf %251, %218 : vector<8x32xf32>
    %255 = arith.mulf %250, %252 : vector<8x32xf32>
    %256 = arith.addf %254, %255 : vector<8x32xf32>
    %257 = math.tanh %256 : vector<8x32xf32>
    %258 = arith.mulf %253, %257 : vector<8x32xf32>
    %259 = arith.negf %243 : vector<8x128xf32>
    %260 = math.exp %259 : vector<8x128xf32>
    %cst_28 = arith.constant 1.000000e+00 : f32
    %261 = vector.broadcast %cst_28 : f32 to vector<8x128xf32>
    %262 = arith.addf %261, %260 : vector<8x128xf32>
    %263 = arith.divf %261, %262 : vector<8x128xf32>
    %264 = math.tanh %243 : vector<8x128xf32>
    %265 = vector.extract_strided_slice %263 {offsets = [0, 0], sizes = [8, 32], strides = [1, 1]} : vector<8x128xf32> to vector<8x32xf32>
    %266 = vector.extract_strided_slice %263 {offsets = [0, 32], sizes = [8, 32], strides = [1, 1]} : vector<8x128xf32> to vector<8x32xf32>
    %267 = vector.extract_strided_slice %264 {offsets = [0, 64], sizes = [8, 32], strides = [1, 1]} : vector<8x128xf32> to vector<8x32xf32>
    %268 = vector.extract_strided_slice %263 {offsets = [0, 96], sizes = [8, 32], strides = [1, 1]} : vector<8x128xf32> to vector<8x32xf32>
    %269 = arith.mulf %266, %233 : vector<8x32xf32>
    %270 = arith.mulf %265, %267 : vector<8x32xf32>
    %271 = arith.addf %269, %270 : vector<8x32xf32>
    %272 = math.tanh %271 : vector<8x32xf32>
    %273 = arith.mulf %268, %272 : vector<8x32xf32>
    %274 = tpu.concatenate %258, %273 in 1 : vector<8x32xf32>, vector<8x32xf32> -> vector<8x64xf32>
    %cst_29 = arith.constant dense<0.000000e+00> : vector<8x256xf32>
    %275 = tpu.matmul %274, %7, %cst_29 {dimension_numbers = #tpu.dot_dimension_numbers<[1], [0], [0], [1], [0, 0, 1, 1], [], []>} : vector<8x64xf32>, vector<64x256xf32>, vector<8x256xf32> -> vector<8x256xf32>
    %276 = vector.extract_strided_slice %6 {offsets = [56, 0], sizes = [8, 128], strides = [1, 1]} : vector<64x256xf32> to vector<8x128xf32>
    %277 = vector.extract_strided_slice %275 {offsets = [0, 0], sizes = [8, 128], strides = [1, 1]} : vector<8x256xf32> to vector<8x128xf32>
    %278 = arith.addf %276, %277 : vector<8x128xf32>
    %279 = vector.extract_strided_slice %6 {offsets = [0, 128], sizes = [8, 128], strides = [1, 1]} : vector<64x256xf32> to vector<8x128xf32>
    %280 = vector.extract_strided_slice %275 {offsets = [0, 128], sizes = [8, 128], strides = [1, 1]} : vector<8x256xf32> to vector<8x128xf32>
    %281 = arith.addf %279, %280 : vector<8x128xf32>
    %282 = arith.negf %278 : vector<8x128xf32>
    %283 = math.exp %282 : vector<8x128xf32>
    %cst_30 = arith.constant 1.000000e+00 : f32
    %284 = vector.broadcast %cst_30 : f32 to vector<8x128xf32>
    %285 = arith.addf %284, %283 : vector<8x128xf32>
    %286 = arith.divf %284, %285 : vector<8x128xf32>
    %287 = math.tanh %278 : vector<8x128xf32>
    %288 = vector.extract_strided_slice %286 {offsets = [0, 0], sizes = [8, 32], strides = [1, 1]} : vector<8x128xf32> to vector<8x32xf32>
    %289 = vector.extract_strided_slice %286 {offsets = [0, 32], sizes = [8, 32], strides = [1, 1]} : vector<8x128xf32> to vector<8x32xf32>
    %290 = vector.extract_strided_slice %287 {offsets = [0, 64], sizes = [8, 32], strides = [1, 1]} : vector<8x128xf32> to vector<8x32xf32>
    %291 = vector.extract_strided_slice %286 {offsets = [0, 96], sizes = [8, 32], strides = [1, 1]} : vector<8x128xf32> to vector<8x32xf32>
    %292 = arith.mulf %289, %256 : vector<8x32xf32>
    %293 = arith.mulf %288, %290 : vector<8x32xf32>
    %294 = arith.addf %292, %293 : vector<8x32xf32>
    %295 = math.tanh %294 : vector<8x32xf32>
    %296 = arith.mulf %291, %295 : vector<8x32xf32>
    %297 = arith.negf %281 : vector<8x128xf32>
    %298 = math.exp %297 : vector<8x128xf32>
    %cst_31 = arith.constant 1.000000e+00 : f32
    %299 = vector.broadcast %cst_31 : f32 to vector<8x128xf32>
    %300 = arith.addf %299, %298 : vector<8x128xf32>
    %301 = arith.divf %299, %300 : vector<8x128xf32>
    %302 = math.tanh %281 : vector<8x128xf32>
    %303 = vector.extract_strided_slice %301 {offsets = [0, 0], sizes = [8, 32], strides = [1, 1]} : vector<8x128xf32> to vector<8x32xf32>
    %304 = vector.extract_strided_slice %301 {offsets = [0, 32], sizes = [8, 32], strides = [1, 1]} : vector<8x128xf32> to vector<8x32xf32>
    %305 = vector.extract_strided_slice %302 {offsets = [0, 64], sizes = [8, 32], strides = [1, 1]} : vector<8x128xf32> to vector<8x32xf32>
    %306 = vector.extract_strided_slice %301 {offsets = [0, 96], sizes = [8, 32], strides = [1, 1]} : vector<8x128xf32> to vector<8x32xf32>
    %307 = arith.mulf %304, %271 : vector<8x32xf32>
    %308 = arith.mulf %303, %305 : vector<8x32xf32>
    %309 = arith.addf %307, %308 : vector<8x32xf32>
    %310 = math.tanh %309 : vector<8x32xf32>
    %311 = arith.mulf %306, %310 : vector<8x32xf32>
    %312 = tpu.concatenate %30, %311 in 1 : vector<8x32xf32>, vector<8x32xf32> -> vector<8x64xf32>
    %313 = tpu.concatenate %68, %273 in 1 : vector<8x32xf32>, vector<8x32xf32> -> vector<8x64xf32>
    %314 = tpu.concatenate %106, %235 in 1 : vector<8x32xf32>, vector<8x32xf32> -> vector<8x64xf32>
    %315 = tpu.concatenate %144, %197 in 1 : vector<8x32xf32>, vector<8x32xf32> -> vector<8x64xf32>
    %316 = tpu.concatenate %182, %159 in 1 : vector<8x32xf32>, vector<8x32xf32> -> vector<8x64xf32>
    %317 = tpu.concatenate %220, %121 in 1 : vector<8x32xf32>, vector<8x32xf32> -> vector<8x64xf32>
    %318 = tpu.concatenate %258, %83 in 1 : vector<8x32xf32>, vector<8x32xf32> -> vector<8x64xf32>
    %319 = tpu.concatenate %296, %45 in 1 : vector<8x32xf32>, vector<8x32xf32> -> vector<8x64xf32>
    %320 = tpu.concatenate %312, %313, %314, %315, %316, %317, %318, %319 in 0 : vector<8x64xf32>, vector<8x64xf32>, vector<8x64xf32>, vector<8x64xf32>, vector<8x64xf32>, vector<8x64xf32>, vector<8x64xf32>, vector<8x64xf32> -> vector<64x64xf32>
    %c0_32 = arith.constant 0 : index
    %c0_33 = arith.constant 0 : index
    %321 = vector.load %arg4[%c0_32, %c0_33] : memref<64x256xf32, #tpu.memory_space<vmem>>, vector<64x256xf32>
    %cst_34 = arith.constant dense<0.000000e+00> : vector<64x256xf32>
    %322 = tpu.matmul %320, %321, %cst_34 {dimension_numbers = #tpu.dot_dimension_numbers<[1], [0], [0], [1], [0, 0, 1, 1], [], []>} : vector<64x64xf32>, vector<64x256xf32>, vector<64x256xf32> -> vector<64x256xf32>
    %c0_35 = arith.constant 0 : index
    %c0_36 = arith.constant 0 : index
    %323 = vector.load %arg6[%c0_35, %c0_36] : memref<1x256xf32, #tpu.memory_space<vmem>>, vector<1x256xf32>
    %324 = vector.broadcast %323 : vector<1x256xf32> to vector<64x256xf32>
    %325 = arith.addf %322, %324 : vector<64x256xf32>
    %c0_37 = arith.constant 0 : index
    %c0_38 = arith.constant 0 : index
    %326 = vector.load %arg5[%c0_37, %c0_38] : memref<64x256xf32, #tpu.memory_space<vmem>>, vector<64x256xf32>
    %327 = vector.extract_strided_slice %325 {offsets = [56, 128], sizes = [8, 128], strides = [1, 1]} : vector<64x256xf32> to vector<8x128xf32>
    %328 = arith.negf %327 : vector<8x128xf32>
    %329 = math.exp %328 : vector<8x128xf32>
    %cst_39 = arith.constant 1.000000e+00 : f32
    %330 = vector.broadcast %cst_39 : f32 to vector<8x128xf32>
    %331 = arith.addf %330, %329 : vector<8x128xf32>
    %332 = arith.divf %330, %331 : vector<8x128xf32>
    %333 = math.tanh %327 : vector<8x128xf32>
    %334 = vector.extract_strided_slice %332 {offsets = [0, 0], sizes = [8, 32], strides = [1, 1]} : vector<8x128xf32> to vector<8x32xf32>
    %335 = vector.extract_strided_slice %332 {offsets = [0, 32], sizes = [8, 32], strides = [1, 1]} : vector<8x128xf32> to vector<8x32xf32>
    %336 = vector.extract_strided_slice %333 {offsets = [0, 64], sizes = [8, 32], strides = [1, 1]} : vector<8x128xf32> to vector<8x32xf32>
    %337 = vector.extract_strided_slice %332 {offsets = [0, 96], sizes = [8, 32], strides = [1, 1]} : vector<8x128xf32> to vector<8x32xf32>
    %338 = arith.mulf %335, %0 : vector<8x32xf32>
    %339 = arith.mulf %334, %336 : vector<8x32xf32>
    %340 = arith.addf %338, %339 : vector<8x32xf32>
    %341 = math.tanh %340 : vector<8x32xf32>
    %342 = arith.mulf %337, %341 : vector<8x32xf32>
    %343 = vector.extract_strided_slice %326 {offsets = [0, 0], sizes = [32, 128], strides = [1, 1]} : vector<64x256xf32> to vector<32x128xf32>
    %344 = vector.extract_strided_slice %325 {offsets = [0, 0], sizes = [8, 128], strides = [1, 1]} : vector<64x256xf32> to vector<8x128xf32>
    %cst_40 = arith.constant dense<0.000000e+00> : vector<8x128xf32>
    %345 = tpu.matmul %0, %343, %cst_40 {dimension_numbers = #tpu.dot_dimension_numbers<[1], [0], [0], [1], [0, 0, 1, 1], [], []>} : vector<8x32xf32>, vector<32x128xf32>, vector<8x128xf32> -> vector<8x128xf32>
    %346 = arith.addf %344, %345 : vector<8x128xf32>
    %347 = arith.negf %346 : vector<8x128xf32>
    %348 = math.exp %347 : vector<8x128xf32>
    %cst_41 = arith.constant 1.000000e+00 : f32
    %349 = vector.broadcast %cst_41 : f32 to vector<8x128xf32>
    %350 = arith.addf %349, %348 : vector<8x128xf32>
    %351 = arith.divf %349, %350 : vector<8x128xf32>
    %352 = math.tanh %346 : vector<8x128xf32>
    %353 = vector.extract_strided_slice %351 {offsets = [0, 0], sizes = [8, 32], strides = [1, 1]} : vector<8x128xf32> to vector<8x32xf32>
    %354 = vector.extract_strided_slice %351 {offsets = [0, 32], sizes = [8, 32], strides = [1, 1]} : vector<8x128xf32> to vector<8x32xf32>
    %355 = vector.extract_strided_slice %352 {offsets = [0, 64], sizes = [8, 32], strides = [1, 1]} : vector<8x128xf32> to vector<8x32xf32>
    %356 = vector.extract_strided_slice %351 {offsets = [0, 96], sizes = [8, 32], strides = [1, 1]} : vector<8x128xf32> to vector<8x32xf32>
    %357 = arith.mulf %354, %0 : vector<8x32xf32>
    %358 = arith.mulf %353, %355 : vector<8x32xf32>
    %359 = arith.addf %357, %358 : vector<8x32xf32>
    %360 = math.tanh %359 : vector<8x32xf32>
    %361 = arith.mulf %356, %360 : vector<8x32xf32>
    %362 = vector.extract_strided_slice %325 {offsets = [8, 0], sizes = [8, 128], strides = [1, 1]} : vector<64x256xf32> to vector<8x128xf32>
    %cst_42 = arith.constant dense<0.000000e+00> : vector<8x128xf32>
    %363 = tpu.matmul %361, %343, %cst_42 {dimension_numbers = #tpu.dot_dimension_numbers<[1], [0], [0], [1], [0, 0, 1, 1], [], []>} : vector<8x32xf32>, vector<32x128xf32>, vector<8x128xf32> -> vector<8x128xf32>
    %364 = arith.addf %362, %363 : vector<8x128xf32>
    %365 = arith.negf %364 : vector<8x128xf32>
    %366 = math.exp %365 : vector<8x128xf32>
    %cst_43 = arith.constant 1.000000e+00 : f32
    %367 = vector.broadcast %cst_43 : f32 to vector<8x128xf32>
    %368 = arith.addf %367, %366 : vector<8x128xf32>
    %369 = arith.divf %367, %368 : vector<8x128xf32>
    %370 = math.tanh %364 : vector<8x128xf32>
    %371 = vector.extract_strided_slice %369 {offsets = [0, 0], sizes = [8, 32], strides = [1, 1]} : vector<8x128xf32> to vector<8x32xf32>
    %372 = vector.extract_strided_slice %369 {offsets = [0, 32], sizes = [8, 32], strides = [1, 1]} : vector<8x128xf32> to vector<8x32xf32>
    %373 = vector.extract_strided_slice %370 {offsets = [0, 64], sizes = [8, 32], strides = [1, 1]} : vector<8x128xf32> to vector<8x32xf32>
    %374 = vector.extract_strided_slice %369 {offsets = [0, 96], sizes = [8, 32], strides = [1, 1]} : vector<8x128xf32> to vector<8x32xf32>
    %375 = arith.mulf %372, %359 : vector<8x32xf32>
    %376 = arith.mulf %371, %373 : vector<8x32xf32>
    %377 = arith.addf %375, %376 : vector<8x32xf32>
    %378 = math.tanh %377 : vector<8x32xf32>
    %379 = arith.mulf %374, %378 : vector<8x32xf32>
    %380 = vector.extract_strided_slice %325 {offsets = [16, 0], sizes = [8, 128], strides = [1, 1]} : vector<64x256xf32> to vector<8x128xf32>
    %cst_44 = arith.constant dense<0.000000e+00> : vector<8x128xf32>
    %381 = tpu.matmul %379, %343, %cst_44 {dimension_numbers = #tpu.dot_dimension_numbers<[1], [0], [0], [1], [0, 0, 1, 1], [], []>} : vector<8x32xf32>, vector<32x128xf32>, vector<8x128xf32> -> vector<8x128xf32>
    %382 = arith.addf %380, %381 : vector<8x128xf32>
    %383 = arith.negf %382 : vector<8x128xf32>
    %384 = math.exp %383 : vector<8x128xf32>
    %cst_45 = arith.constant 1.000000e+00 : f32
    %385 = vector.broadcast %cst_45 : f32 to vector<8x128xf32>
    %386 = arith.addf %385, %384 : vector<8x128xf32>
    %387 = arith.divf %385, %386 : vector<8x128xf32>
    %388 = math.tanh %382 : vector<8x128xf32>
    %389 = vector.extract_strided_slice %387 {offsets = [0, 0], sizes = [8, 32], strides = [1, 1]} : vector<8x128xf32> to vector<8x32xf32>
    %390 = vector.extract_strided_slice %387 {offsets = [0, 32], sizes = [8, 32], strides = [1, 1]} : vector<8x128xf32> to vector<8x32xf32>
    %391 = vector.extract_strided_slice %388 {offsets = [0, 64], sizes = [8, 32], strides = [1, 1]} : vector<8x128xf32> to vector<8x32xf32>
    %392 = vector.extract_strided_slice %387 {offsets = [0, 96], sizes = [8, 32], strides = [1, 1]} : vector<8x128xf32> to vector<8x32xf32>
    %393 = arith.mulf %390, %377 : vector<8x32xf32>
    %394 = arith.mulf %389, %391 : vector<8x32xf32>
    %395 = arith.addf %393, %394 : vector<8x32xf32>
    %396 = math.tanh %395 : vector<8x32xf32>
    %397 = arith.mulf %392, %396 : vector<8x32xf32>
    %398 = vector.extract_strided_slice %325 {offsets = [24, 0], sizes = [8, 128], strides = [1, 1]} : vector<64x256xf32> to vector<8x128xf32>
    %cst_46 = arith.constant dense<0.000000e+00> : vector<8x128xf32>
    %399 = tpu.matmul %397, %343, %cst_46 {dimension_numbers = #tpu.dot_dimension_numbers<[1], [0], [0], [1], [0, 0, 1, 1], [], []>} : vector<8x32xf32>, vector<32x128xf32>, vector<8x128xf32> -> vector<8x128xf32>
    %400 = arith.addf %398, %399 : vector<8x128xf32>
    %401 = arith.negf %400 : vector<8x128xf32>
    %402 = math.exp %401 : vector<8x128xf32>
    %cst_47 = arith.constant 1.000000e+00 : f32
    %403 = vector.broadcast %cst_47 : f32 to vector<8x128xf32>
    %404 = arith.addf %403, %402 : vector<8x128xf32>
    %405 = arith.divf %403, %404 : vector<8x128xf32>
    %406 = math.tanh %400 : vector<8x128xf32>
    %407 = vector.extract_strided_slice %405 {offsets = [0, 0], sizes = [8, 32], strides = [1, 1]} : vector<8x128xf32> to vector<8x32xf32>
    %408 = vector.extract_strided_slice %405 {offsets = [0, 32], sizes = [8, 32], strides = [1, 1]} : vector<8x128xf32> to vector<8x32xf32>
    %409 = vector.extract_strided_slice %406 {offsets = [0, 64], sizes = [8, 32], strides = [1, 1]} : vector<8x128xf32> to vector<8x32xf32>
    %410 = vector.extract_strided_slice %405 {offsets = [0, 96], sizes = [8, 32], strides = [1, 1]} : vector<8x128xf32> to vector<8x32xf32>
    %411 = arith.mulf %408, %395 : vector<8x32xf32>
    %412 = arith.mulf %407, %409 : vector<8x32xf32>
    %413 = arith.addf %411, %412 : vector<8x32xf32>
    %414 = math.tanh %413 : vector<8x32xf32>
    %415 = arith.mulf %410, %414 : vector<8x32xf32>
    %416 = vector.extract_strided_slice %325 {offsets = [32, 0], sizes = [8, 128], strides = [1, 1]} : vector<64x256xf32> to vector<8x128xf32>
    %cst_48 = arith.constant dense<0.000000e+00> : vector<8x128xf32>
    %417 = tpu.matmul %415, %343, %cst_48 {dimension_numbers = #tpu.dot_dimension_numbers<[1], [0], [0], [1], [0, 0, 1, 1], [], []>} : vector<8x32xf32>, vector<32x128xf32>, vector<8x128xf32> -> vector<8x128xf32>
    %418 = arith.addf %416, %417 : vector<8x128xf32>
    %419 = arith.negf %418 : vector<8x128xf32>
    %420 = math.exp %419 : vector<8x128xf32>
    %cst_49 = arith.constant 1.000000e+00 : f32
    %421 = vector.broadcast %cst_49 : f32 to vector<8x128xf32>
    %422 = arith.addf %421, %420 : vector<8x128xf32>
    %423 = arith.divf %421, %422 : vector<8x128xf32>
    %424 = math.tanh %418 : vector<8x128xf32>
    %425 = vector.extract_strided_slice %423 {offsets = [0, 0], sizes = [8, 32], strides = [1, 1]} : vector<8x128xf32> to vector<8x32xf32>
    %426 = vector.extract_strided_slice %423 {offsets = [0, 32], sizes = [8, 32], strides = [1, 1]} : vector<8x128xf32> to vector<8x32xf32>
    %427 = vector.extract_strided_slice %424 {offsets = [0, 64], sizes = [8, 32], strides = [1, 1]} : vector<8x128xf32> to vector<8x32xf32>
    %428 = vector.extract_strided_slice %423 {offsets = [0, 96], sizes = [8, 32], strides = [1, 1]} : vector<8x128xf32> to vector<8x32xf32>
    %429 = arith.mulf %426, %413 : vector<8x32xf32>
    %430 = arith.mulf %425, %427 : vector<8x32xf32>
    %431 = arith.addf %429, %430 : vector<8x32xf32>
    %432 = math.tanh %431 : vector<8x32xf32>
    %433 = arith.mulf %428, %432 : vector<8x32xf32>
    %434 = vector.extract_strided_slice %325 {offsets = [40, 0], sizes = [8, 128], strides = [1, 1]} : vector<64x256xf32> to vector<8x128xf32>
    %cst_50 = arith.constant dense<0.000000e+00> : vector<8x128xf32>
    %435 = tpu.matmul %433, %343, %cst_50 {dimension_numbers = #tpu.dot_dimension_numbers<[1], [0], [0], [1], [0, 0, 1, 1], [], []>} : vector<8x32xf32>, vector<32x128xf32>, vector<8x128xf32> -> vector<8x128xf32>
    %436 = arith.addf %434, %435 : vector<8x128xf32>
    %437 = arith.negf %436 : vector<8x128xf32>
    %438 = math.exp %437 : vector<8x128xf32>
    %cst_51 = arith.constant 1.000000e+00 : f32
    %439 = vector.broadcast %cst_51 : f32 to vector<8x128xf32>
    %440 = arith.addf %439, %438 : vector<8x128xf32>
    %441 = arith.divf %439, %440 : vector<8x128xf32>
    %442 = math.tanh %436 : vector<8x128xf32>
    %443 = vector.extract_strided_slice %441 {offsets = [0, 0], sizes = [8, 32], strides = [1, 1]} : vector<8x128xf32> to vector<8x32xf32>
    %444 = vector.extract_strided_slice %441 {offsets = [0, 32], sizes = [8, 32], strides = [1, 1]} : vector<8x128xf32> to vector<8x32xf32>
    %445 = vector.extract_strided_slice %442 {offsets = [0, 64], sizes = [8, 32], strides = [1, 1]} : vector<8x128xf32> to vector<8x32xf32>
    %446 = vector.extract_strided_slice %441 {offsets = [0, 96], sizes = [8, 32], strides = [1, 1]} : vector<8x128xf32> to vector<8x32xf32>
    %447 = arith.mulf %444, %431 : vector<8x32xf32>
    %448 = arith.mulf %443, %445 : vector<8x32xf32>
    %449 = arith.addf %447, %448 : vector<8x32xf32>
    %450 = math.tanh %449 : vector<8x32xf32>
    %451 = arith.mulf %446, %450 : vector<8x32xf32>
    %452 = vector.extract_strided_slice %325 {offsets = [48, 0], sizes = [8, 128], strides = [1, 1]} : vector<64x256xf32> to vector<8x128xf32>
    %cst_52 = arith.constant dense<0.000000e+00> : vector<8x128xf32>
    %453 = tpu.matmul %451, %343, %cst_52 {dimension_numbers = #tpu.dot_dimension_numbers<[1], [0], [0], [1], [0, 0, 1, 1], [], []>} : vector<8x32xf32>, vector<32x128xf32>, vector<8x128xf32> -> vector<8x128xf32>
    %454 = arith.addf %452, %453 : vector<8x128xf32>
    %455 = arith.negf %454 : vector<8x128xf32>
    %456 = math.exp %455 : vector<8x128xf32>
    %cst_53 = arith.constant 1.000000e+00 : f32
    %457 = vector.broadcast %cst_53 : f32 to vector<8x128xf32>
    %458 = arith.addf %457, %456 : vector<8x128xf32>
    %459 = arith.divf %457, %458 : vector<8x128xf32>
    %460 = math.tanh %454 : vector<8x128xf32>
    %461 = vector.extract_strided_slice %459 {offsets = [0, 0], sizes = [8, 32], strides = [1, 1]} : vector<8x128xf32> to vector<8x32xf32>
    %462 = vector.extract_strided_slice %459 {offsets = [0, 32], sizes = [8, 32], strides = [1, 1]} : vector<8x128xf32> to vector<8x32xf32>
    %463 = vector.extract_strided_slice %460 {offsets = [0, 64], sizes = [8, 32], strides = [1, 1]} : vector<8x128xf32> to vector<8x32xf32>
    %464 = vector.extract_strided_slice %459 {offsets = [0, 96], sizes = [8, 32], strides = [1, 1]} : vector<8x128xf32> to vector<8x32xf32>
    %465 = arith.mulf %462, %449 : vector<8x32xf32>
    %466 = arith.mulf %461, %463 : vector<8x32xf32>
    %467 = arith.addf %465, %466 : vector<8x32xf32>
    %468 = math.tanh %467 : vector<8x32xf32>
    %469 = arith.mulf %464, %468 : vector<8x32xf32>
    %470 = vector.extract_strided_slice %325 {offsets = [56, 0], sizes = [8, 128], strides = [1, 1]} : vector<64x256xf32> to vector<8x128xf32>
    %cst_54 = arith.constant dense<0.000000e+00> : vector<8x128xf32>
    %471 = tpu.matmul %469, %343, %cst_54 {dimension_numbers = #tpu.dot_dimension_numbers<[1], [0], [0], [1], [0, 0, 1, 1], [], []>} : vector<8x32xf32>, vector<32x128xf32>, vector<8x128xf32> -> vector<8x128xf32>
    %472 = arith.addf %470, %471 : vector<8x128xf32>
    %473 = arith.negf %472 : vector<8x128xf32>
    %474 = math.exp %473 : vector<8x128xf32>
    %cst_55 = arith.constant 1.000000e+00 : f32
    %475 = vector.broadcast %cst_55 : f32 to vector<8x128xf32>
    %476 = arith.addf %475, %474 : vector<8x128xf32>
    %477 = arith.divf %475, %476 : vector<8x128xf32>
    %478 = math.tanh %472 : vector<8x128xf32>
    %479 = vector.extract_strided_slice %477 {offsets = [0, 0], sizes = [8, 32], strides = [1, 1]} : vector<8x128xf32> to vector<8x32xf32>
    %480 = vector.extract_strided_slice %477 {offsets = [0, 32], sizes = [8, 32], strides = [1, 1]} : vector<8x128xf32> to vector<8x32xf32>
    %481 = vector.extract_strided_slice %478 {offsets = [0, 64], sizes = [8, 32], strides = [1, 1]} : vector<8x128xf32> to vector<8x32xf32>
    %482 = vector.extract_strided_slice %477 {offsets = [0, 96], sizes = [8, 32], strides = [1, 1]} : vector<8x128xf32> to vector<8x32xf32>
    %483 = arith.mulf %480, %467 : vector<8x32xf32>
    %484 = arith.mulf %479, %481 : vector<8x32xf32>
    %485 = arith.addf %483, %484 : vector<8x32xf32>
    %486 = math.tanh %485 : vector<8x32xf32>
    %487 = arith.mulf %482, %486 : vector<8x32xf32>
    %c0_56 = arith.constant 0 : index
    %c0_57 = arith.constant 0 : index
    %488 = vector.load %arg7[%c0_56, %c0_57] : memref<64x4xf32, #tpu.memory_space<vmem>>, vector<32x4xf32>
    %cst_58 = arith.constant dense<0.000000e+00> : vector<8x4xf32>
    %489 = tpu.matmul %487, %488, %cst_58 {dimension_numbers = #tpu.dot_dimension_numbers<[1], [0], [0], [1], [0, 0, 1, 1], [], []>} : vector<8x32xf32>, vector<32x4xf32>, vector<8x4xf32> -> vector<8x4xf32>
    %c32 = arith.constant 32 : index
    %c0_59 = arith.constant 0 : index
    %490 = vector.load %arg7[%c32, %c0_59] : memref<64x4xf32, #tpu.memory_space<vmem>>, vector<32x4xf32>
    %cst_60 = arith.constant dense<0.000000e+00> : vector<8x4xf32>
    %491 = tpu.matmul %342, %490, %cst_60 {dimension_numbers = #tpu.dot_dimension_numbers<[1], [0], [0], [1], [0, 0, 1, 1], [], []>} : vector<8x32xf32>, vector<32x4xf32>, vector<8x4xf32> -> vector<8x4xf32>
    %492 = arith.addf %489, %491 : vector<8x4xf32>
    %c0_61 = arith.constant 0 : index
    %c0_62 = arith.constant 0 : index
    %493 = vector.load %arg8[%c0_61, %c0_62] : memref<1x4xf32, #tpu.memory_space<vmem>>, vector<1x4xf32>
    %494 = vector.broadcast %493 : vector<1x4xf32> to vector<8x4xf32>
    %495 = arith.addf %492, %494 : vector<8x4xf32>
    %c0_63 = arith.constant 0 : index
    %c0_64 = arith.constant 0 : index
    %496 = vector.load %arg9[%c0_63, %c0_64] : memref<8x4xf32, #tpu.memory_space<vmem>>, vector<8x4xf32>
    tpu.vector_store %arg9[%c0_63, %c0_64], %495 {strides = array<i32>} : memref<8x4xf32, #tpu.memory_space<vmem>>, vector<8x4xf32>,
    return
  }
}

</mosaic_0001>

<bundles_post_ra>
// kernel: tpu_custom_call.1
= control target key start
LH: loop header
LB: loop body
LE: loop exit
PB: predicated region body
PF: predicated region fallthrough
CT: control target
= control target key end

     0   :  { %14 = vsyncpa [#allocation3], 0  ;;  %s3779_s0 = inlined_call_operand.vmem [shape: f32[64,16], index: 0, kind: input, shape index: {}]   ;;  %s3780_s1 = inlined_call_operand.hbm [shape: f32[16,256], index: 1, kind: input, shape index: {}]   ;;  %s3781_s2 = inlined_call_operand.vmem [shape: f32[64,256], index: 2, kind: input, shape index: {}]   ;;  %s3782_s3 = inlined_call_operand.vmem [shape: f32[1,256], index: 3, kind: input, shape index: {}]   ;;  %s3783_s4 = inlined_call_operand.hbm [shape: f32[64,256], index: 4, kind: input, shape index: {}]   ;;  %s3784_s5 = inlined_call_operand.hbm [shape: f32[64,256], index: 5, kind: input, shape index: {}]   ;;  %s3785_s6 = inlined_call_operand.vmem [shape: f32[1,256], index: 6, kind: input, shape index: {}]   ;;  %s3786_s7 = inlined_call_operand.vmem [shape: f32[64,4], index: 7, kind: input, shape index: {}]   ;;  %s3787_s8 = inlined_call_operand.vmem [shape: f32[1,4], index: 8, kind: input, shape index: {}]   ;;  %s3788_s9 = inlined_call_operand.vmem [shape: f32[8,4], index: 9, kind: output, shape index: {}]  }
   0x1   :  { %15 = vsyncpa [#allocation5], 0  ;;  %s2972_s30 = smov [#allocation4]   ;;  %s2973_s11 = smov [#allocation2]  }
   0x2   :  { %s39_s10 = sshll.u32 %s2972_s30, 4  ;;  %s23_s12 = sshll.u32 %s2973_s11, 4  ;;  %s40_s10 = int_to_ptr.vmem [resolvable:$true] %s39_s10  ;;  %s24_s12 = int_to_ptr.vmem [resolvable:$true] %s23_s12 }
   0x3   :  { %s2916_s13 = scalar_lea.vmem %s40_s10, 2048  ;;  %p2921_p1 = scmp.lt.s32.totalorder %s40_s10, %s40_s10 }
   0x4   :  { %p2917_p0 = scmp.ne.s32.totalorder %s40_s10, %s2916_s13  ;;  %p2922_p2 = scmp.lt.s32.totalorder %s2916_s13, %s2916_s13 }
   0x6   :  { %p2923_p3 = por %p2922_p2, %p2921_p1 }
   0x8   :  { %p2924_p4 = pnand %p2923_p3, %p2917_p0 }
   0xa   :  { %2927 = shalt.err (!%p2924_p4)
}
   0xb   :  { %s2974_s14 = smov 256   ;;  %s2975_s15 = smov 16  }
   0xc   :  { %45 = dma.hbm_to_vmem [thread:$0]  %s3783_s4, 2048, %s40_s10, [#allocation5], %s2974_s14, %s2974_s14, %s2975_s15  }
   0xd   :  { %s2936_s18 = scalar_lea.vmem %s24_s12, 512  ;;  %p2941_p6 = scmp.lt.s32.totalorder %s24_s12, %s24_s12 }
   0xe   :  { %p2937_p5 = scmp.ne.s32.totalorder %s24_s12, %s2936_s18  ;;  %p2942_p7 = scmp.lt.s32.totalorder %s2936_s18, %s2936_s18 }
  0x10   :  { %p2943_p8 = por %p2942_p7, %p2941_p6 }
  0x12   :  { %p2944_p9 = pnand %p2943_p8, %p2937_p5 }
  0x14   :  { %2947 = shalt.err (!%p2944_p9)
}
  0x15   :  { %29 = dma.hbm_to_vmem [thread:$0]  %s3780_s1, 512, %s24_s12, [#allocation3], %s2974_s14, %s2974_s14, %s2975_s15  }
  0x16   :  { %s2976_s21 = smov [#allocation6]  }
  0x17   :  { %s51_s22 = sshll.u32 %s2976_s21, 4  ;;  %s52_s22 = int_to_ptr.vmem [resolvable:$true] %s51_s22 }
  0x18   :  { %s2956_s23 = scalar_lea.vmem %s52_s22, 2048  ;;  %p2961_p11 = scmp.lt.s32.totalorder %s52_s22, %s52_s22 }
  0x19   :  { %p2957_p10 = scmp.ne.s32.totalorder %s52_s22, %s2956_s23  ;;  %p2962_p12 = scmp.lt.s32.totalorder %s2956_s23, %s2956_s23 }
  0x1b   :  { %p2963_p13 = por %p2962_p12, %p2961_p11 }
  0x1d   :  { %p2964_p0 = pnand %p2963_p13, %p2957_p10 }
  0x1f   :  { %2967 = shalt.err (!%p2964_p0)
}
  0x20   :  { %57 = dma.hbm_to_vmem [thread:$0]  %s3784_s5, 2048, %s52_s22, [#allocation5], %s2974_s14, %s2974_s14, %s2975_s15  }
  0x21   :  { %2968 = dma.done.wait [#allocation3], 512  }
  0x22   :  { %2969 = vsyncadd [#allocation3], 4294966784 }
  0x23   :  { %2970 = dma.done.wait [#allocation5], 4096  }
  0x24   :  { %2971 = vsyncadd [#allocation5], 4294963200  ;;  %v2977_v0 = vmov 0.0   ;;  %v84_v1 = vld [vmem:[#allocation2 + $0x18] sm:$0xff]  ;;  %v83_v3 = vld [vmem:[#allocation2 + $0x10] sm:$0xff]  ;;  %vm97_vm0 = vcmask 130048   ;;  %v87_v29 = vlaneseq }
  0x25   :  { %186 = vmatprep.mubr.f32.mxu0 %v2977_v0  ;;  %319 = vmatprep.mubr.f32.mxu1 %v2977_v0  ;;  %v3045_v2 = vld [vmem:[%s3781_s2 + $0x78] sm:$0xff]  ;;  %v3051_v4 = vld [vmem:[%s3781_s2 + $0x70] sm:$0xff]  ;;  %v82_v5 = vld [vmem:[#allocation2 + $0x8] sm:$0xff]  ;;  %s2979_s1 = smov 32   ;;  %vm384_vm1 = vcmask 261120   ;;  %vm251_vm2 = vcmask 523264  }
  0x26   :  { %150 = vmatprep.subr.mxu0 %v84_v1  ;;  %271 = vmatprep.subr.mxu1 %v3045_v2  ;;  %v3056_v6 = vld [vmem:[%s3781_s2 + $0x68] sm:$0xff]  ;;  %v81_v7 = vld [vmem:[#allocation2] sm:$0xff]  ;;  %v3071_v10 = vld [vmem:[%s3781_s2 + $0x58] sm:$0xff]  ;;  %v3214_v30 = vshrl.u32 %v87_v29, 7  ;;  %vm2980_vm3 = vmmov 0   ;;  %vm2473_vm4 = vcmask 31744  }
  0x27   :  { %151 = vmatpush1.msra.mxu0 %v83_v3  ;;  %272 = vmatpush1.msra.mxu1 %v3051_v4  ;;  %v3062_v8 = vld [vmem:[%s3781_s2 + $0x60] sm:$0xff]  ;;  %v3076_v11 = vld [vmem:[%s3781_s2 + $0x50] sm:$0xff]  ;;  %v3082_v12 = vld [vmem:[%s3781_s2 + $0x48] sm:$0xff] }
  0x28   :  { %v73_v9 = vld [vmem:[%s3779_s0] sm:$0xff]  ;;  %152 = vmatprep.subr.mxu0 %v82_v5  ;;  %273 = vmatprep.subr.mxu1 %v3056_v6  ;;  %v74_v14 = vld [vmem:[%s3779_s0 + $0x8] sm:$0xff]  ;;  %v3099_v15 = vld [vmem:[%s3781_s2 + $0x38] sm:$0xff]  ;;  %v93_v31 = vsub.s32 1, %v3214_v30  ;;  %v89_v33 = vsub.s32 0, %v3214_v30 }
  0x29   :  { %153 = vmatpush1.msra.mxu0 %v81_v7  ;;  %274 = vmatpush1.msra.mxu1 %v3062_v8  ;;  %v3089_v13 = vld [vmem:[%s3781_s2 + $0x40] sm:$0xff]  ;;  %v3105_v16 = vld [vmem:[%s3781_s2 + $0x30] sm:$0xff]  ;;  %v3112_v17 = vld [vmem:[%s3781_s2 + $0x28] sm:$0xff] }
  0x2a   :  { %2481 = vmatmul.mubr.msk.f32.vlgmr.msra.gmra.mxu0 %vm97_vm0, %v73_v9  ;;  %275 = vmatprep.subr.mxu1 %v3071_v10  ;;  %v3120_v18 = vld [vmem:[%s3781_s2 + $0x20] sm:$0xff]  ;;  %v75_v19 = vld [vmem:[%s3779_s0 + $0x10] sm:$0xff]  ;;  %v3130_v20 = vld [vmem:[%s3781_s2 + $0x18] sm:$0xff] }
  0x2b   :  { %276 = vmatpush1.msra.mxu1 %v3076_v11  ;;  %192 = vmatprep.mubr.f32.mxu0 %v2977_v0  ;;  %v3136_v21 = vld [vmem:[%s3781_s2 + $0x10] sm:$0xff]  ;;  %v3143_v22 = vld [vmem:[%s3781_s2 + $0x8] sm:$0xff]  ;;  %v3151_v23 = vld [vmem:[%s3781_s2] sm:$0xff] }
  0x2c   :  { %277 = vmatprep.subr.mxu1 %v3082_v12  ;;  %538 = vmatprep.subr.mxu0 %v3045_v2  ;;  %v76_v24 = vld [vmem:[%s3779_s0 + $0x18] sm:$0xff]  ;;  %v77_v25 = vld [vmem:[%s3779_s0 + $0x20] sm:$0xff]  ;;  %v78_v26 = vld [vmem:[%s3779_s0 + $0x28] sm:$0xff] }
  0x2d   :  { %278 = vmatpush1.msra.mxu1 %v3089_v13  ;;  %539 = vmatpush1.msra.mxu0 %v3051_v4  ;;  %v79_v27 = vld [vmem:[%s3779_s0 + $0x30] sm:$0xff]  ;;  %v80_v28 = vld [vmem:[%s3779_s0 + $0x38] sm:$0xff]  ;;  %v85_v32 = vld [vmem:[%s3782_s3] sm:$0x3]  ;;  %s2978_s3 = smov 64  }
  0x2e   :  { %2482 = vmatmul.mubr.msk.f32.gmra.mxu0 %vm97_vm0, %v74_v14  ;;  %279 = vmatprep.subr.mxu1 %v3099_v15  ;;  %v94_v34 = vrot.slane %v85_v32, %v93_v31  ;;  %v90_v37 = vrot.slane %v85_v32, %v89_v33 }
  0x2f   :  { %280 = vmatpush1.msra.mxu1 %v3105_v16  ;;  %198 = vmatprep.mubr.f32.mxu0 %v2977_v0 }
  0x30   :  { %281 = vmatprep.subr.mxu1 %v3112_v17  ;;  %540 = vmatprep.subr.mxu0 %v3056_v6 }
  0x31   :  { %282 = vmatpush1.msra.mxu1 %v3120_v18  ;;  %541 = vmatpush1.msra.mxu0 %v3062_v8 }
  0x32   :  { %2483 = vmatmul.mubr.msk.f32.gmra.mxu0 %vm97_vm0, %v75_v19  ;;  %283 = vmatprep.subr.mxu1 %v3130_v20 }
  0x33   :  { %284 = vmatpush1.msra.mxu1 %v3136_v21  ;;  %204 = vmatprep.mubr.f32.mxu0 %v2977_v0 }
  0x34   :  { %285 = vmatprep.subr.mxu1 %v3143_v22  ;;  %542 = vmatprep.subr.mxu0 %v3071_v10 }
  0x35   :  { %286 = vmatpush1.msra.mxu1 %v3151_v23  ;;  %543 = vmatpush1.msra.mxu0 %v3076_v11 }
  0x36   :  { %2484 = vmatmul.mubr.msk.f32.gmra.mxu0 %vm97_vm0, %v76_v24  ;;  %320 = vmatmul.mubr.f32.vlgmr.msra.gmra.mxu1 %v2977_v0 }
  0x37   :  { %210 = vmatprep.mubr.f32.mxu0 %v2977_v0  ;;  %405 = vmatprep.subr.mxu1 %v3045_v2 }
  0x38   :  { %406 = vmatpush1.msra.mxu1 %v3051_v4  ;;  %453 = vmatprep.mubr.f32.mxu1 %v2977_v0 }
  0x39   :  { %407 = vmatprep.subr.mxu1 %v3056_v6  ;;  %544 = vmatprep.subr.mxu0 %v3082_v12 }
  0x3a   :  { %2485 = vmatmul.mubr.msk.f32.gmra.mxu0 %vm97_vm0, %v77_v25  ;;  %408 = vmatpush1.msra.mxu1 %v3062_v8 }
  0x3b   :  { %216 = vmatprep.mubr.f32.mxu0 %v2977_v0  ;;  %409 = vmatprep.subr.mxu1 %v3071_v10 }
  0x3c   :  { %410 = vmatpush1.msra.mxu1 %v3076_v11  ;;  %545 = vmatpush1.msra.mxu0 %v3089_v13 }
  0x3d   :  { %411 = vmatprep.subr.mxu1 %v3082_v12  ;;  %546 = vmatprep.subr.mxu0 %v3099_v15 }
  0x3e   :  { %2486 = vmatmul.mubr.msk.f32.gmra.mxu0 %vm97_vm0, %v78_v26  ;;  %412 = vmatpush1.msra.mxu1 %v3089_v13 }
  0x3f   :  { %222 = vmatprep.mubr.f32.mxu0 %v2977_v0  ;;  %413 = vmatprep.subr.mxu1 %v3099_v15 }
  0x40   :  { %414 = vmatpush1.msra.mxu1 %v3105_v16  ;;  %547 = vmatpush1.msra.mxu0 %v3105_v16 }
  0x41   :  { %415 = vmatprep.subr.mxu1 %v3112_v17  ;;  %548 = vmatprep.subr.mxu0 %v3112_v17 }
  0x42   :  { %2487 = vmatmul.mubr.msk.f32.gmra.mxu0 %vm97_vm0, %v79_v27  ;;  %416 = vmatpush1.msra.mxu1 %v3120_v18 }
  0x43   :  { %228 = vmatprep.mubr.f32.mxu0 %v2977_v0  ;;  %417 = vmatprep.subr.mxu1 %v3130_v20 }
  0x44   :  { %418 = vmatpush1.msra.mxu1 %v3136_v21  ;;  %549 = vmatpush1.msra.mxu0 %v3120_v18 }
  0x45   :  { %419 = vmatprep.subr.mxu1 %v3143_v22  ;;  %550 = vmatprep.subr.mxu0 %v3130_v20 }
  0x46   :  { %2488 = vmatmul.mubr.msk.f32.gmra.mxu0 %vm97_vm0, %v80_v28  ;;  %420 = vmatpush1.msra.mxu1 %v3151_v23 }
  0x47   :  { %551 = vmatpush1.msra.mxu0 %v3136_v21  ;;  %586 = vmatprep.mubr.f32.mxu0 %v2977_v0 }
  0x48   :  { %552 = vmatprep.subr.mxu0 %v3143_v22  ;;  %671 = vmatprep.subr.mxu1 %v3045_v2 }
  0x49   :  { %553 = vmatpush1.msra.mxu0 %v3151_v23 }
  0x4a   :  { %804 = vmatprep.subr.mxu0 %v3045_v2 }
  0xea   :  { %v188_v35 = vpop.f32.mrf.mxu0 }
  0xeb   :  { %v189_v46 = vadd.f32 %v188_v35, %v90_v37 }
  0xec   :  { %v190_v36 = vpop.f32.mrf.mxu0 }
  0xed   :  { %v3225_v38 = vadd.f32 %v190_v36, %v94_v34 }
  0xee   :  { %v194_v39 = vpop.f32.mrf.mxu0 }
  0xef   :  { %v3227_v40 = vadd.f32 %v194_v39, %v90_v37 }
  0xf0   :  { %v196_v41 = vpop.f32.mrf.mxu0 }
  0xf1   :  { %v3229_v42 = vadd.f32 %v196_v41, %v94_v34 }
  0xf2   :  { %v200_v43 = vpop.f32.mrf.mxu0 }
  0xf3   :  { %v3231_v44 = vadd.f32 %v200_v43, %v90_v37 }
  0xf4   :  { %v202_v45 = vpop.f32.mrf.mxu0 }
  0xf5   :  { %v3233_v47 = vadd.f32 %v202_v45, %v94_v34 }
  0xf6   :  { %v206_v48 = vpop.f32.mrf.mxu0  ;;  %v321_v49 = vpop.f32.mrf.mxu1 }
  0xf7   :  { %v3235_v50 = vadd.f32 %v206_v48, %v90_v37  ;;  %v326_v51 = vadd.f32 %v321_v49, %v189_v46 }
  0xf8   :  { %v208_v52 = vpop.f32.mrf.mxu0  ;;  %v323_v24 = vpop.f32.mrf.mxu1 }
  0xf9   :  { %2708 = vtanh.f32 %v326_v51  ;;  %v3237_v53 = vadd.f32 %v208_v52, %v94_v34  ;;  %v2489_v27 = vmul.f32 -1.442695, %v326_v51 }
  0xfa   :  { %v212_v54 = vpop.f32.mrf.mxu0 }
  0xfb   :  { %v3239_v55 = vadd.f32 %v212_v54, %v90_v37 }
  0xfc   :  { %v214_v56 = vpop.f32.mrf.mxu0 }
  0xfd   :  { %v3241_v57 = vadd.f32 %v214_v56, %v94_v34 }
  0xfe   :  { %v218_v58 = vpop.f32.mrf.mxu0 }
  0xff   :  { %v3243_v59 = vadd.f32 %v218_v58, %v90_v37 }
 0x100   :  { %v220_v60 = vpop.f32.mrf.mxu0 }
 0x101   :  { %v3245_v61 = vadd.f32 %v220_v60, %v94_v34 }
 0x102   :  { %v224_v62 = vpop.f32.mrf.mxu0 }
 0x103   :  { %v3247_v63 = vadd.f32 %v224_v62, %v90_v37 }
 0x104   :  { %v226_v1 = vpop.f32.mrf.mxu0 }
 0x105   :  { %v3249_v3 = vadd.f32 %v226_v1, %v94_v34 }
 0x106   :  { %v2709_v5 = vpop.eup %2708  ;;  %v230_v7 = vpop.f32.mrf.mxu0 }
 0x107   :  { %v3251_v9 = vadd.f32 %v230_v7, %v90_v37  ;;  %337 = vrot.lane.b32.xlu0 %v2709_v5, %s2978_s3 }
 0x108   :  { %v232_v14 = vpop.f32.mrf.mxu0 }
 0x109   :  { %v233_v19 = vadd.f32 %v232_v14, %v94_v34 }
 0x10b   :  { %v327_v25 = vadd.f32 %v323_v24, %v233_v19 }
 0x10d   :  { %2710 = vtanh.f32 %v327_v25  ;;  %v2490_v32 = vmul.f32 -1.442695, %v327_v25 }
 0x10e   :  { %2712 = vpow2.f32 %v2489_v27 }
 0x11a   :  { %v2711_v26 = vpop.eup %2710 }
 0x11b   :  { %361 = vrot.lane.b32.xlu0 %v2711_v26, %s2978_s3  ;;  %v2713_v28 = vpop.eup %2712 }
 0x11c   :  { %v331_v29 = vadd.f32 1.0, %v2713_v28 }
 0x11e   :  { %2714 = vrcp.f32 %v331_v29 }
 0x11f   :  { %2716 = vpow2.f32 %v2490_v32 }
 0x12b   :  { %v2715_v35 = vpop.eup %2714 }
 0x12c   :  { %v2717_v36 = vpop.eup %2716  ;;  %v335_v46 = vmul.f32 0.0, %v2715_v35 }
 0x12d   :  { %v355_v41 = vadd.f32 1.0, %v2717_v36 }
 0x12f   :  { %2718 = vrcp.f32 %v355_v41 }
 0x13c   :  { %v2719_v34 = vpop.eup %2718 }
 0x13d   :  { %v359_v52 = vmul.f32 0.0, %v2719_v34 }
 0x179   :  { %v338_v37 = vpop.permute.xlu0 %337 }
 0x17a   :  { %v340_v39 = vmul.f32 %v2715_v35, %v338_v37 }
 0x17c   :  { %342 = vrot.lane.b32.xlu1 %v340_v39, %s2979_s1 }
 0x18d   :  { %v362_v43 = vpop.permute.xlu0 %361 }
 0x18e   :  { %v364_v45 = vmul.f32 %v2719_v34, %v362_v43 }
 0x190   :  { %366 = vrot.lane.b32.xlu1 %v364_v45, %s2979_s1 }
 0x1ee   :  { %v343_v48 = vpop.permute.xlu1 %342 }
 0x1ef   :  { %v3257_v49 = vadd.f32 %v343_v48, %v335_v46 }
 0x1f1   :  { %2720 = vtanh.f32 %v3257_v49 }
 0x1fe   :  { %v2721_v51 = vpop.eup %2720 }
 0x1ff   :  { %348 = vrot.lane.b32.xlu0 %v2721_v51, %s2978_s3 }
 0x202   :  { %v367_v54 = vpop.permute.xlu1 %366 }
 0x203   :  { %v3261_v56 = vadd.f32 %v367_v54, %v359_v52 }
 0x205   :  { %2722 = vtanh.f32 %v3261_v56 }
 0x212   :  { %v2723_v58 = vpop.eup %2722 }
 0x213   :  { %372 = vrot.lane.b32.xlu1 %v2723_v58, %s2978_s3 }
 0x271   :  { %v349_v60 = vpop.permute.xlu0 %348 }
 0x272   :  { %v351_v62 = vmul.f32 %v2715_v35, %v349_v60 }
 0x274   :  { %377 = vrot.lane.b32.xlu0 %v351_v62, %s2979_s1 }
 0x285   :  { %v373_v1 = vpop.permute.xlu1 %372 }
 0x286   :  { %v375_v5 = vmul.f32 %v2719_v34, %v373_v1 }
 0x288   :  { %381 = vrot.lane.b32.xlu1 %v375_v5, %s2978_s3 }
 0x2e6   :  { %v3267_v7 = vpop.permute.xlu0 %377 }
 0x2fa   :  { %v3269_v14 = vpop.permute.xlu1 %381 }
 0x2fb   :  { %v385_v19 = vsel %vm384_vm1, %v3267_v7, %v3269_v14 }
 0x2fc   :  { %2491 = vmatmul.mubr.msk.f32.vlgmr.msra.gmra.mxu1 %vm251_vm2, %v385_v19 }
 0x2fd   :  { %672 = vmatpush1.msra.mxu1 %v3051_v4  ;;  %719 = vmatprep.mubr.f32.mxu1 %v2977_v0 }
 0x2fe   :  { %673 = vmatprep.subr.mxu1 %v3056_v6 }
 0x2ff   :  { %674 = vmatpush1.msra.mxu1 %v3062_v8 }
 0x300   :  { %675 = vmatprep.subr.mxu1 %v3071_v10 }
 0x301   :  { %676 = vmatpush1.msra.mxu1 %v3076_v11 }
 0x302   :  { %677 = vmatprep.subr.mxu1 %v3082_v12 }
 0x303   :  { %678 = vmatpush1.msra.mxu1 %v3089_v13 }
 0x304   :  { %679 = vmatprep.subr.mxu1 %v3099_v15 }
 0x305   :  { %680 = vmatpush1.msra.mxu1 %v3105_v16 }
 0x306   :  { %681 = vmatprep.subr.mxu1 %v3112_v17 }
 0x307   :  { %682 = vmatpush1.msra.mxu1 %v3120_v18 }
 0x308   :  { %683 = vmatprep.subr.mxu1 %v3130_v20 }
 0x309   :  { %684 = vmatpush1.msra.mxu1 %v3136_v21 }
 0x30a   :  { %685 = vmatprep.subr.mxu1 %v3143_v22 }
 0x30b   :  { %686 = vmatpush1.msra.mxu1 %v3151_v23 }
 0x30c   :  { %937 = vmatprep.subr.mxu1 %v3045_v2 }
 0x3bc   :  { %v455_v24 = vpop.f32.mrf.mxu1 }
 0x3bd   :  { %v460_v25 = vadd.f32 %v455_v24, %v3227_v40 }
 0x3be   :  { %v457_v26 = vpop.f32.mrf.mxu1 }
 0x3bf   :  { %2724 = vtanh.f32 %v460_v25  ;;  %v461_v27 = vadd.f32 %v457_v26, %v3249_v3  ;;  %v2492_v32 = vmul.f32 -1.442695, %v460_v25 }
 0x3c1   :  { %2726 = vtanh.f32 %v461_v27  ;;  %v2493_v35 = vmul.f32 -1.442695, %v461_v27 }
 0x3c2   :  { %2728 = vpow2.f32 %v2492_v32 }
 0x3c3   :  { %2730 = vpow2.f32 %v2493_v35 }
 0x3cc   :  { %v2725_v28 = vpop.eup %2724 }
 0x3cd   :  { %471 = vrot.lane.b32.xlu0 %v2725_v28, %s2978_s3 }
 0x3ce   :  { %v2727_v29 = vpop.eup %2726 }
 0x3cf   :  { %495 = vrot.lane.b32.xlu1 %v2727_v29, %s2978_s3  ;;  %v2729_v36 = vpop.eup %2728 }
 0x3d0   :  { %v2731_v37 = vpop.eup %2730  ;;  %v465_v39 = vadd.f32 1.0, %v2729_v36 }
 0x3d1   :  { %v489_v41 = vadd.f32 1.0, %v2731_v37 }
 0x3d2   :  { %2732 = vrcp.f32 %v465_v39 }
 0x3d3   :  { %2734 = vrcp.f32 %v489_v41 }
 0x3df   :  { %v2733_v40 = vpop.eup %2732 }
 0x3e0   :  { %v2735_v43 = vpop.eup %2734  ;;  %v469_v48 = vmul.f32 %v2733_v40, %v3257_v49 }
 0x3e1   :  { %v493_v54 = vmul.f32 %v2735_v43, %v3261_v56 }
 0x43f   :  { %v472_v34 = vpop.permute.xlu0 %471 }
 0x440   :  { %v474_v3 = vmul.f32 %v2733_v40, %v472_v34 }
 0x441   :  { %v496_v45 = vpop.permute.xlu1 %495 }
 0x442   :  { %476 = vrot.lane.b32.xlu0 %v474_v3, %s2979_s1  ;;  %v498_v46 = vmul.f32 %v2735_v43, %v496_v45 }
 0x444   :  { %500 = vrot.lane.b32.xlu1 %v498_v46, %s2979_s1 }
 0x4b4   :  { %v477_v51 = vpop.permute.xlu0 %476 }
 0x4b5   :  { %v3299_v52 = vadd.f32 %v477_v51, %v469_v48 }
 0x4b6   :  { %v501_v58 = vpop.permute.xlu1 %500 }
 0x4b7   :  { %2736 = vtanh.f32 %v3299_v52  ;;  %v3303_v60 = vadd.f32 %v501_v58, %v493_v54 }
 0x4b9   :  { %2738 = vtanh.f32 %v3303_v60 }
 0x4c4   :  { %v2737_v62 = vpop.eup %2736 }
 0x4c5   :  { %482 = vrot.lane.b32.xlu0 %v2737_v62, %s2978_s3 }
 0x4c6   :  { %v2739_v1 = vpop.eup %2738 }
 0x4c7   :  { %506 = vrot.lane.b32.xlu1 %v2739_v1, %s2978_s3 }
 0x537   :  { %v483_v5 = vpop.permute.xlu0 %482 }
 0x538   :  { %v485_v49 = vmul.f32 %v2733_v40, %v483_v5 }
 0x539   :  { %v507_v19 = vpop.permute.xlu1 %506 }
 0x53a   :  { %511 = vrot.lane.b32.xlu0 %v485_v49, %s2979_s1  ;;  %v509_v24 = vmul.f32 %v2735_v43, %v507_v19 }
 0x53c   :  { %515 = vrot.lane.b32.xlu1 %v509_v24, %s2978_s3 }
 0x5ac   :  { %v3310_v56 = vpop.permute.xlu0 %511 }
 0x5ae   :  { %v3312_v25 = vpop.permute.xlu1 %515 }
 0x5af   :  { %v518_v26 = vsel %vm384_vm1, %v3310_v56, %v3312_v25 }
 0x5b0   :  { %2494 = vmatmul.mubr.msk.f32.vlgmr.msra.gmra.mxu0 %vm251_vm2, %v518_v26 }
 0x5b1   :  { %805 = vmatpush1.msra.mxu0 %v3051_v4  ;;  %852 = vmatprep.mubr.f32.mxu0 %v2977_v0 }
 0x5b2   :  { %806 = vmatprep.subr.mxu0 %v3056_v6 }
 0x5b3   :  { %807 = vmatpush1.msra.mxu0 %v3062_v8 }
 0x5b4   :  { %808 = vmatprep.subr.mxu0 %v3071_v10 }
 0x5b5   :  { %809 = vmatpush1.msra.mxu0 %v3076_v11 }
 0x5b6   :  { %810 = vmatprep.subr.mxu0 %v3082_v12 }
 0x5b7   :  { %811 = vmatpush1.msra.mxu0 %v3089_v13 }
 0x5b8   :  { %812 = vmatprep.subr.mxu0 %v3099_v15 }
 0x5b9   :  { %813 = vmatpush1.msra.mxu0 %v3105_v16 }
 0x5ba   :  { %814 = vmatprep.subr.mxu0 %v3112_v17 }
 0x5bb   :  { %815 = vmatpush1.msra.mxu0 %v3120_v18 }
 0x5bc   :  { %816 = vmatprep.subr.mxu0 %v3130_v20 }
 0x5bd   :  { %817 = vmatpush1.msra.mxu0 %v3136_v21 }
 0x5be   :  { %818 = vmatprep.subr.mxu0 %v3143_v22 }
 0x5bf   :  { %819 = vmatpush1.msra.mxu0 %v3151_v23 }
 0x5c0   :  { %1070 = vmatprep.subr.mxu0 %v3045_v2 }
 0x670   :  { %v588_v27 = vpop.f32.mrf.mxu0 }
 0x671   :  { %v593_v28 = vadd.f32 %v588_v27, %v3231_v44 }
 0x672   :  { %v590_v29 = vpop.f32.mrf.mxu0 }
 0x673   :  { %2740 = vtanh.f32 %v593_v28  ;;  %v594_v32 = vadd.f32 %v590_v29, %v3245_v61  ;;  %v2495_v37 = vmul.f32 -1.442695, %v593_v28 }
 0x675   :  { %2742 = vtanh.f32 %v594_v32  ;;  %v2496_v39 = vmul.f32 -1.442695, %v594_v32 }
 0x676   :  { %2744 = vpow2.f32 %v2495_v37 }
 0x677   :  { %2746 = vpow2.f32 %v2496_v39 }
 0x680   :  { %v2741_v35 = vpop.eup %2740 }
 0x681   :  { %604 = vrot.lane.b32.xlu0 %v2741_v35, %s2978_s3 }
 0x682   :  { %v2743_v36 = vpop.eup %2742 }
 0x683   :  { %628 = vrot.lane.b32.xlu1 %v2743_v36, %s2978_s3  ;;  %v2745_v41 = vpop.eup %2744 }
 0x684   :  { %v2747_v40 = vpop.eup %2746  ;;  %v598_v34 = vadd.f32 1.0, %v2745_v41 }
 0x685   :  { %v622_v3 = vadd.f32 1.0, %v2747_v40 }
 0x686   :  { %2748 = vrcp.f32 %v598_v34 }
 0x687   :  { %2750 = vrcp.f32 %v622_v3 }
 0x693   :  { %v2749_v44 = vpop.eup %2748 }
 0x694   :  { %v2751_v45 = vpop.eup %2750  ;;  %v602_v51 = vmul.f32 %v2749_v44, %v3299_v52 }
 0x695   :  { %v626_v62 = vmul.f32 %v2751_v45, %v3303_v60 }
 0x6f3   :  { %v605_v43 = vpop.permute.xlu0 %604 }
 0x6f4   :  { %v607_v61 = vmul.f32 %v2749_v44, %v605_v43 }
 0x6f5   :  { %v629_v46 = vpop.permute.xlu1 %628 }
 0x6f6   :  { %609 = vrot.lane.b32.xlu0 %v607_v61, %s2979_s1  ;;  %v631_v48 = vmul.f32 %v2751_v45, %v629_v46 }
 0x6f8   :  { %633 = vrot.lane.b32.xlu1 %v631_v48, %s2979_s1 }
 0x768   :  { %v610_v54 = vpop.permute.xlu0 %609 }
 0x769   :  { %v3342_v58 = vadd.f32 %v610_v54, %v602_v51 }
 0x76a   :  { %v634_v1 = vpop.permute.xlu1 %633 }
 0x76b   :  { %2752 = vtanh.f32 %v3342_v58  ;;  %v3346_v5 = vadd.f32 %v634_v1, %v626_v62 }
 0x76d   :  { %2754 = vtanh.f32 %v3346_v5 }
 0x778   :  { %v2753_v49 = vpop.eup %2752 }
 0x779   :  { %615 = vrot.lane.b32.xlu0 %v2753_v49, %s2978_s3 }
 0x77a   :  { %v2755_v19 = vpop.eup %2754 }
 0x77b   :  { %639 = vrot.lane.b32.xlu1 %v2755_v19, %s2978_s3 }
 0x7eb   :  { %v616_v24 = vpop.permute.xlu0 %615 }
 0x7ec   :  { %v618_v52 = vmul.f32 %v2749_v44, %v616_v24 }
 0x7ed   :  { %v640_v26 = vpop.permute.xlu1 %639 }
 0x7ee   :  { %644 = vrot.lane.b32.xlu0 %v618_v52, %s2979_s1  ;;  %v642_v27 = vmul.f32 %v2751_v45, %v640_v26 }
 0x7f0   :  { %648 = vrot.lane.b32.xlu1 %v642_v27, %s2978_s3 }
 0x860   :  { %v3353_v60 = vpop.permute.xlu0 %644 }
 0x862   :  { %v3355_v28 = vpop.permute.xlu1 %648 }
 0x863   :  { %v651_v29 = vsel %vm384_vm1, %v3353_v60, %v3355_v28 }
 0x864   :  { %2497 = vmatmul.mubr.msk.f32.vlgmr.msra.gmra.mxu1 %vm251_vm2, %v651_v29 }
 0x865   :  { %938 = vmatpush1.msra.mxu1 %v3051_v4  ;;  %985 = vmatprep.mubr.f32.mxu1 %v2977_v0 }
 0x866   :  { %939 = vmatprep.subr.mxu1 %v3056_v6 }
 0x867   :  { %940 = vmatpush1.msra.mxu1 %v3062_v8 }
 0x868   :  { %941 = vmatprep.subr.mxu1 %v3071_v10 }
 0x869   :  { %942 = vmatpush1.msra.mxu1 %v3076_v11 }
 0x86a   :  { %943 = vmatprep.subr.mxu1 %v3082_v12 }
 0x86b   :  { %944 = vmatpush1.msra.mxu1 %v3089_v13 }
 0x86c   :  { %945 = vmatprep.subr.mxu1 %v3099_v15 }
 0x86d   :  { %946 = vmatpush1.msra.mxu1 %v3105_v16 }
 0x86e   :  { %947 = vmatprep.subr.mxu1 %v3112_v17 }
 0x86f   :  { %948 = vmatpush1.msra.mxu1 %v3120_v18 }
 0x870   :  { %949 = vmatprep.subr.mxu1 %v3130_v20 }
 0x871   :  { %950 = vmatpush1.msra.mxu1 %v3136_v21 }
 0x872   :  { %951 = vmatprep.subr.mxu1 %v3143_v22 }
 0x873   :  { %952 = vmatpush1.msra.mxu1 %v3151_v23 }
 0x874   :  { %1203 = vmatprep.subr.mxu1 %v3045_v2 }
 0x924   :  { %v721_v32 = vpop.f32.mrf.mxu1 }
 0x925   :  { %v726_v35 = vadd.f32 %v721_v32, %v3235_v50 }
 0x926   :  { %v723_v36 = vpop.f32.mrf.mxu1 }
 0x927   :  { %2756 = vtanh.f32 %v726_v35  ;;  %v727_v37 = vadd.f32 %v723_v36, %v3241_v57  ;;  %v2498_v40 = vmul.f32 -1.442695, %v726_v35 }
 0x929   :  { %2758 = vtanh.f32 %v727_v37  ;;  %v2499_v34 = vmul.f32 -1.442695, %v727_v37 }
 0x92a   :  { %2760 = vpow2.f32 %v2498_v40 }
 0x92b   :  { %2762 = vpow2.f32 %v2499_v34 }
 0x934   :  { %v2757_v39 = vpop.eup %2756 }
 0x935   :  { %737 = vrot.lane.b32.xlu0 %v2757_v39, %s2978_s3 }
 0x936   :  { %v2759_v41 = vpop.eup %2758 }
 0x937   :  { %761 = vrot.lane.b32.xlu1 %v2759_v41, %s2978_s3  ;;  %v2761_v3 = vpop.eup %2760 }
 0x938   :  { %v2763_v2 = vpop.eup %2762  ;;  %v731_v44 = vadd.f32 1.0, %v2761_v3 }
 0x939   :  { %v755_v43 = vadd.f32 1.0, %v2763_v2 }
 0x93a   :  { %2764 = vrcp.f32 %v731_v44 }
 0x93b   :  { %2766 = vrcp.f32 %v755_v43 }
 0x947   :  { %v2765_v50 = vpop.eup %2764 }
 0x948   :  { %v2767_v45 = vpop.eup %2766  ;;  %v735_v51 = vmul.f32 %v2765_v50, %v3342_v58 }
 0x949   :  { %v759_v1 = vmul.f32 %v2767_v45, %v3346_v5 }
 0x9a7   :  { %v738_v61 = vpop.permute.xlu0 %737 }
 0x9a8   :  { %v740_v57 = vmul.f32 %v2765_v50, %v738_v61 }
 0x9a9   :  { %v762_v46 = vpop.permute.xlu1 %761 }
 0x9aa   :  { %742 = vrot.lane.b32.xlu0 %v740_v57, %s2979_s1  ;;  %v764_v48 = vmul.f32 %v2767_v45, %v762_v46 }
 0x9ac   :  { %766 = vrot.lane.b32.xlu1 %v764_v48, %s2979_s1 }
 0xa1c   :  { %v743_v54 = vpop.permute.xlu0 %742 }
 0xa1d   :  { %v3385_v62 = vadd.f32 %v743_v54, %v735_v51 }
 0xa1e   :  { %v767_v49 = vpop.permute.xlu1 %766 }
 0xa1f   :  { %2768 = vtanh.f32 %v3385_v62  ;;  %v3389_v19 = vadd.f32 %v767_v49, %v759_v1 }
 0xa21   :  { %2770 = vtanh.f32 %v3389_v19 }
 0xa2c   :  { %v2769_v24 = vpop.eup %2768 }
 0xa2d   :  { %748 = vrot.lane.b32.xlu0 %v2769_v24, %s2978_s3 }
 0xa2e   :  { %v2771_v52 = vpop.eup %2770 }
 0xa2f   :  { %772 = vrot.lane.b32.xlu1 %v2771_v52, %s2978_s3 }
 0xa9f   :  { %v749_v26 = vpop.permute.xlu0 %748 }
 0xaa0   :  { %v751_v58 = vmul.f32 %v2765_v50, %v749_v26 }
 0xaa1   :  { %v773_v27 = vpop.permute.xlu1 %772 }
 0xaa2   :  { %777 = vrot.lane.b32.xlu0 %v751_v58, %s2979_s1  ;;  %v775_v29 = vmul.f32 %v2767_v45, %v773_v27 }
 0xaa4   :  { %781 = vrot.lane.b32.xlu1 %v775_v29, %s2978_s3 }
 0xb14   :  { %v3396_v5 = vpop.permute.xlu0 %777 }
 0xb16   :  { %v3398_v32 = vpop.permute.xlu1 %781 }
 0xb17   :  { %v784_v35 = vsel %vm384_vm1, %v3396_v5, %v3398_v32 }
 0xb18   :  { %2500 = vmatmul.mubr.msk.f32.vlgmr.msra.gmra.mxu0 %vm251_vm2, %v784_v35 }
 0xb19   :  { %1071 = vmatpush1.msra.mxu0 %v3051_v4  ;;  %1118 = vmatprep.mubr.f32.mxu0 %v2977_v0 }
 0xb1a   :  { %1072 = vmatprep.subr.mxu0 %v3056_v6 }
 0xb1b   :  { %1073 = vmatpush1.msra.mxu0 %v3062_v8 }
 0xb1c   :  { %1074 = vmatprep.subr.mxu0 %v3071_v10 }
 0xb1d   :  { %1075 = vmatpush1.msra.mxu0 %v3076_v11 }
 0xb1e   :  { %1076 = vmatprep.subr.mxu0 %v3082_v12 }
 0xb1f   :  { %1077 = vmatpush1.msra.mxu0 %v3089_v13 }
 0xb20   :  { %1078 = vmatprep.subr.mxu0 %v3099_v15 }
 0xb21   :  { %1079 = vmatpush1.msra.mxu0 %v3105_v16 }
 0xb22   :  { %1080 = vmatprep.subr.mxu0 %v3112_v17 }
 0xb23   :  { %1081 = vmatpush1.msra.mxu0 %v3120_v18 }
 0xb24   :  { %1082 = vmatprep.subr.mxu0 %v3130_v20 }
 0xb25   :  { %1083 = vmatpush1.msra.mxu0 %v3136_v21 }
 0xb26   :  { %1084 = vmatprep.subr.mxu0 %v3143_v22 }
 0xb27   :  { %1085 = vmatpush1.msra.mxu0 %v3151_v23 }
 0xbd8   :  { %v854_v36 = vpop.f32.mrf.mxu0 }
 0xbd9   :  { %v859_v37 = vadd.f32 %v854_v36, %v3239_v55 }
 0xbda   :  { %v856_v39 = vpop.f32.mrf.mxu0 }
 0xbdb   :  { %2772 = vtanh.f32 %v859_v37  ;;  %v860_v41 = vadd.f32 %v856_v39, %v3237_v53  ;;  %v2501_v3 = vmul.f32 -1.442695, %v859_v37 }
 0xbdd   :  { %2774 = vtanh.f32 %v860_v41  ;;  %v2502_v2 = vmul.f32 -1.442695, %v860_v41 }
 0xbde   :  { %2776 = vpow2.f32 %v2501_v3 }
 0xbdf   :  { %2778 = vpow2.f32 %v2502_v2 }
 0xbe8   :  { %v2773_v40 = vpop.eup %2772 }
 0xbe9   :  { %870 = vrot.lane.b32.xlu0 %v2773_v40, %s2978_s3 }
 0xbea   :  { %v2775_v34 = vpop.eup %2774 }
 0xbeb   :  { %894 = vrot.lane.b32.xlu1 %v2775_v34, %s2978_s3  ;;  %v2777_v44 = vpop.eup %2776 }
 0xbec   :  { %v2779_v43 = vpop.eup %2778  ;;  %v864_v50 = vadd.f32 1.0, %v2777_v44 }
 0xbed   :  { %v888_v61 = vadd.f32 1.0, %v2779_v43 }
 0xbee   :  { %2780 = vrcp.f32 %v864_v50 }
 0xbef   :  { %2782 = vrcp.f32 %v888_v61 }
 0xbfb   :  { %v2781_v55 = vpop.eup %2780 }
 0xbfc   :  { %v2783_v45 = vpop.eup %2782  ;;  %v868_v51 = vmul.f32 %v2781_v55, %v3385_v62 }
 0xbfd   :  { %v892_v49 = vmul.f32 %v2783_v45, %v3389_v19 }
 0xc5b   :  { %v871_v57 = vpop.permute.xlu0 %870 }
 0xc5c   :  { %v873_v53 = vmul.f32 %v2781_v55, %v871_v57 }
 0xc5d   :  { %v895_v46 = vpop.permute.xlu1 %894 }
 0xc5e   :  { %875 = vrot.lane.b32.xlu0 %v873_v53, %s2979_s1  ;;  %v897_v48 = vmul.f32 %v2783_v45, %v895_v46 }
 0xc60   :  { %899 = vrot.lane.b32.xlu1 %v897_v48, %s2979_s1 }
 0xcd0   :  { %v876_v54 = vpop.permute.xlu0 %875 }
 0xcd1   :  { %v3427_v1 = vadd.f32 %v876_v54, %v868_v51 }
 0xcd2   :  { %v900_v24 = vpop.permute.xlu1 %899 }
 0xcd3   :  { %2784 = vtanh.f32 %v3427_v1  ;;  %v3431_v52 = vadd.f32 %v900_v24, %v892_v49 }
 0xcd5   :  { %2786 = vtanh.f32 %v3431_v52 }
 0xce0   :  { %v2785_v26 = vpop.eup %2784 }
 0xce1   :  { %881 = vrot.lane.b32.xlu0 %v2785_v26, %s2978_s3 }
 0xce2   :  { %v2787_v58 = vpop.eup %2786 }
 0xce3   :  { %905 = vrot.lane.b32.xlu1 %v2787_v58, %s2978_s3 }
 0xd53   :  { %v882_v27 = vpop.permute.xlu0 %881 }
 0xd54   :  { %v884_v62 = vmul.f32 %v2781_v55, %v882_v27 }
 0xd55   :  { %v906_v29 = vpop.permute.xlu1 %905 }
 0xd56   :  { %910 = vrot.lane.b32.xlu0 %v884_v62, %s2979_s1  ;;  %v908_v35 = vmul.f32 %v2783_v45, %v906_v29 }
 0xd58   :  { %914 = vrot.lane.b32.xlu1 %v908_v35, %s2978_s3 }
 0xdc8   :  { %v3438_v19 = vpop.permute.xlu0 %910 }
 0xdca   :  { %v3440_v36 = vpop.permute.xlu1 %914 }
 0xdcb   :  { %v917_v37 = vsel %vm384_vm1, %v3438_v19, %v3440_v36 }
 0xdcc   :  { %2503 = vmatmul.mubr.msk.f32.vlgmr.msra.gmra.mxu1 %vm251_vm2, %v917_v37 }
 0xdcd   :  { %1204 = vmatpush1.msra.mxu1 %v3051_v4  ;;  %1251 = vmatprep.mubr.f32.mxu1 %v2977_v0 }
 0xdce   :  { %1205 = vmatprep.subr.mxu1 %v3056_v6 }
 0xdcf   :  { %1206 = vmatpush1.msra.mxu1 %v3062_v8 }
 0xdd0   :  { %1207 = vmatprep.subr.mxu1 %v3071_v10 }
 0xdd1   :  { %1208 = vmatpush1.msra.mxu1 %v3076_v11 }
 0xdd2   :  { %1209 = vmatprep.subr.mxu1 %v3082_v12 }
 0xdd3   :  { %1210 = vmatpush1.msra.mxu1 %v3089_v13 }
 0xdd4   :  { %1211 = vmatprep.subr.mxu1 %v3099_v15 }
 0xdd5   :  { %1212 = vmatpush1.msra.mxu1 %v3105_v16 }
 0xdd6   :  { %1213 = vmatprep.subr.mxu1 %v3112_v17 }
 0xdd7   :  { %1214 = vmatpush1.msra.mxu1 %v3120_v18 }
 0xdd8   :  { %1215 = vmatprep.subr.mxu1 %v3130_v20 }
 0xdd9   :  { %1216 = vmatpush1.msra.mxu1 %v3136_v21 }
 0xdda   :  { %1217 = vmatprep.subr.mxu1 %v3143_v22 }
 0xddb   :  { %1218 = vmatpush1.msra.mxu1 %v3151_v23 }
 0xddc   :  { %2589 = vmatprep.subr.mxu1 %v2977_v0 }
 0xe8c   :  { %v987_v4 = vpop.f32.mrf.mxu1 }
 0xe8d   :  { %v992_v6 = vadd.f32 %v987_v4, %v3243_v59 }
 0xe8e   :  { %v989_v8 = vpop.f32.mrf.mxu1 }
 0xe8f   :  { %2788 = vtanh.f32 %v992_v6  ;;  %v993_v10 = vadd.f32 %v989_v8, %v3233_v47  ;;  %v2504_v13 = vmul.f32 -1.442695, %v992_v6 }
 0xe91   :  { %2790 = vtanh.f32 %v993_v10  ;;  %v2505_v15 = vmul.f32 -1.442695, %v993_v10 }
 0xe92   :  { %2792 = vpow2.f32 %v2504_v13 }
 0xe93   :  { %2794 = vpow2.f32 %v2505_v15 }
 0xe9c   :  { %v2789_v11 = vpop.eup %2788 }
 0xe9d   :  { %1003 = vrot.lane.b32.xlu0 %v2789_v11, %s2978_s3 }
 0xe9e   :  { %v2791_v12 = vpop.eup %2790 }
 0xe9f   :  { %1027 = vrot.lane.b32.xlu1 %v2791_v12, %s2978_s3  ;;  %v2793_v16 = vpop.eup %2792 }
 0xea0   :  { %v2795_v17 = vpop.eup %2794  ;;  %v997_v18 = vadd.f32 1.0, %v2793_v16 }
 0xea1   :  { %v1021_v20 = vadd.f32 1.0, %v2795_v17 }
 0xea2   :  { %2796 = vrcp.f32 %v997_v18 }
 0xea3   :  { %2798 = vrcp.f32 %v1021_v20 }
 0xeaf   :  { %v2797_v21 = vpop.eup %2796 }
 0xeb0   :  { %v2799_v47 = vpop.eup %2798  ;;  %v1001_v41 = vmul.f32 %v2797_v21, %v3427_v1 }
 0xeb1   :  { %v1025_v3 = vmul.f32 %v2799_v47, %v3431_v52 }
 0xf0f   :  { %v1004_v22 = vpop.permute.xlu0 %1003 }
 0xf10   :  { %v1006_v23 = vmul.f32 %v2797_v21, %v1004_v22 }
 0xf11   :  { %v1028_v59 = vpop.permute.xlu1 %1027 }
 0xf12   :  { %1008 = vrot.lane.b32.xlu0 %v1006_v23, %s2979_s1  ;;  %v1030_v39 = vmul.f32 %v2799_v47, %v1028_v59 }
 0xf14   :  { %1032 = vrot.lane.b32.xlu1 %v1030_v39, %s2979_s1 }
 0xf84   :  { %v1009_v40 = vpop.permute.xlu0 %1008 }
 0xf85   :  { %v1011_v34 = vadd.f32 %v1009_v40, %v1001_v41 }
 0xf86   :  { %v1033_v2 = vpop.permute.xlu1 %1032 }
 0xf87   :  { %2800 = vtanh.f32 %v1011_v34  ;;  %v1035_v44 = vadd.f32 %v1033_v2, %v1025_v3 }
 0xf89   :  { %2802 = vtanh.f32 %v1035_v44 }
 0xf94   :  { %v2801_v43 = vpop.eup %2800 }
 0xf95   :  { %1014 = vrot.lane.b32.xlu0 %v2801_v43, %s2978_s3 }
 0xf96   :  { %v2803_v50 = vpop.eup %2802 }
 0xf97   :  { %1038 = vrot.lane.b32.xlu1 %v2803_v50, %s2978_s3 }
0x1007   :  { %v1015_v61 = vpop.permute.xlu0 %1014 }
0x1008   :  { %v1017_v55 = vmul.f32 %v2797_v21, %v1015_v61 }
0x1009   :  { %v1039_v57 = vpop.permute.xlu1 %1038 }
0x100a   :  { %1043 = vrot.lane.b32.xlu0 %v1017_v55, %s2979_s1  ;;  %v1041_v53 = vmul.f32 %v2799_v47, %v1039_v57 }
0x100c   :  { %1047 = vrot.lane.b32.xlu1 %v1041_v53, %s2978_s3 }
0x107c   :  { %v3475_v45 = vpop.permute.xlu0 %1043 }
0x107e   :  { %v3477_v46 = vpop.permute.xlu1 %1047 }
0x107f   :  { %v1050_v48 = vsel %vm384_vm1, %v3475_v45, %v3477_v46 }
0x1080   :  { %2506 = vmatmul.mubr.msk.f32.vlgmr.msra.gmra.mxu0 %vm251_vm2, %v1050_v48  ;;  %v1339_v48 = vld [vmem:[#allocation4 + $0x78] sm:$0xff] }
0x1081   :  { %1440 = vmatprep.mubr.f32.mxu0 %v2977_v0  ;;  %1392 = vmatprep.subr.mxu0 %v1339_v48 }
0x1140   :  { %v1120_v51 = vpop.f32.mrf.mxu0 }
0x1141   :  { %v1125_v54 = vadd.f32 %v1120_v51, %v3247_v63  ;;  %v1338_v51 = vld [vmem:[#allocation4 + $0x70] sm:$0xff] }
0x1142   :  { %v1122_v1 = vpop.f32.mrf.mxu0  ;;  %1393 = vmatpush1.msra.mxu0 %v1338_v51 }
0x1143   :  { %2804 = vtanh.f32 %v1125_v54  ;;  %v1126_v49 = vadd.f32 %v1122_v1, %v3229_v42  ;;  %v2507_v26 = vmul.f32 -1.442695, %v1125_v54  ;;  %v1337_v54 = vld [vmem:[#allocation4 + $0x68] sm:$0xff]  ;;  %v1336_v1 = vld [vmem:[#allocation4 + $0x60] sm:$0xff] }
0x1144   :  { %1394 = vmatprep.subr.mxu0 %v1337_v54 }
0x1145   :  { %2806 = vtanh.f32 %v1126_v49  ;;  %v2508_v58 = vmul.f32 -1.442695, %v1126_v49  ;;  %v1335_v49 = vld [vmem:[#allocation4 + $0x58] sm:$0xff]  ;;  %1395 = vmatpush1.msra.mxu0 %v1336_v1 }
0x1146   :  { %2808 = vpow2.f32 %v2507_v26  ;;  %v1333_v26 = vld [vmem:[#allocation4 + $0x48] sm:$0xff]  ;;  %1396 = vmatprep.subr.mxu0 %v1335_v49 }
0x1147   :  { %2810 = vpow2.f32 %v2508_v58  ;;  %v3518_v58 = vld [vmem:[#allocation6 + $0x20] sm:$0xff] }
0x1150   :  { %v2805_v24 = vpop.eup %2804 }
0x1151   :  { %1136 = vrot.lane.b32.xlu0 %v2805_v24, %s2978_s3  ;;  %v1334_v24 = vld [vmem:[#allocation4 + $0x50] sm:$0xff] }
0x1152   :  { %v2807_v52 = vpop.eup %2806  ;;  %1397 = vmatpush1.msra.mxu0 %v1334_v24 }
0x1153   :  { %1160 = vrot.lane.b32.xlu1 %v2807_v52, %s2978_s3  ;;  %v2809_v27 = vpop.eup %2808  ;;  %v3515_v52 = vld [vmem:[#allocation6 + $0x30] sm:$0xff]  ;;  %1398 = vmatprep.subr.mxu0 %v1333_v26 }
0x1154   :  { %v2811_v62 = vpop.eup %2810  ;;  %v1130_v29 = vadd.f32 1.0, %v2809_v27  ;;  %v1332_v27 = vld [vmem:[#allocation4 + $0x40] sm:$0xff] }
0x1155   :  { %v1154_v35 = vadd.f32 1.0, %v2811_v62  ;;  %v3521_v62 = vld [vmem:[#allocation6 + $0x10] sm:$0xff]  ;;  %1399 = vmatpush1.msra.mxu0 %v1332_v27 }
0x1156   :  { %2812 = vrcp.f32 %v1130_v29  ;;  %v1331_v29 = vld [vmem:[#allocation4 + $0x38] sm:$0xff] }
0x1157   :  { %2814 = vrcp.f32 %v1154_v35  ;;  %v1330_v35 = vld [vmem:[#allocation4 + $0x30] sm:$0xff]  ;;  %1400 = vmatprep.subr.mxu0 %v1331_v29 }
0x1158   :  { %1401 = vmatpush1.msra.mxu0 %v1330_v35 }
0x1163   :  { %v2813_v63 = vpop.eup %2812 }
0x1164   :  { %v2815_v4 = vpop.eup %2814  ;;  %v1134_v10 = vmul.f32 %v2813_v63, %v1011_v34 }
0x1165   :  { %v1158_v13 = vmul.f32 %v2815_v4, %v1035_v44 }
0x11c3   :  { %v1137_v37 = vpop.permute.xlu0 %1136 }
0x11c4   :  { %v1139_v42 = vmul.f32 %v2813_v63, %v1137_v37  ;;  %v1328_v37 = vld [vmem:[#allocation4 + $0x20] sm:$0xff] }
0x11c5   :  { %v1161_v6 = vpop.permute.xlu1 %1160 }
0x11c6   :  { %1141 = vrot.lane.b32.xlu0 %v1139_v42, %s2979_s1  ;;  %v1163_v8 = vmul.f32 %v2815_v4, %v1161_v6  ;;  %v1326_v6 = vld [vmem:[#allocation4 + $0x10] sm:$0xff] }
0x11c8   :  { %1165 = vrot.lane.b32.xlu1 %v1163_v8, %s2979_s1  ;;  %v1325_v8 = vld [vmem:[#allocation4 + $0x8] sm:$0xff] }
0x1238   :  { %v1142_v11 = vpop.permute.xlu0 %1141 }
0x1239   :  { %v3490_v12 = vadd.f32 %v1142_v11, %v1134_v10  ;;  %v1324_v10 = vld [vmem:[#allocation4] sm:$0xff] }
0x123a   :  { %v1166_v15 = vpop.permute.xlu1 %1165  ;;  %v3528_v11 = vld [vmem:[#allocation6] sm:$0xff] }
0x123b   :  { %2816 = vtanh.f32 %v3490_v12  ;;  %v1168_v16 = vadd.f32 %v1166_v15, %v1158_v13 }
0x123d   :  { %2818 = vtanh.f32 %v1168_v16 }
0x1248   :  { %v2817_v17 = vpop.eup %2816 }
0x1249   :  { %1147 = vrot.lane.b32.xlu0 %v2817_v17, %s2978_s3 }
0x124a   :  { %v2819_v18 = vpop.eup %2818 }
0x124b   :  { %1171 = vrot.lane.b32.xlu1 %v2819_v18, %s2978_s3 }
0x12bb   :  { %v1148_v20 = vpop.permute.xlu0 %1147 }
0x12bc   :  { %v1150_v21 = vmul.f32 %v2813_v63, %v1148_v20  ;;  %v1329_v63 = vld [vmem:[#allocation4 + $0x28] sm:$0xff] }
0x12bd   :  { %v1172_v22 = vpop.permute.xlu1 %1171  ;;  %1402 = vmatprep.subr.mxu0 %v1329_v63 }
0x12be   :  { %1176 = vrot.lane.b32.xlu0 %v1150_v21, %s2979_s1  ;;  %v1174_v23 = vmul.f32 %v2815_v4, %v1172_v22  ;;  %v1327_v4 = vld [vmem:[#allocation4 + $0x18] sm:$0xff]  ;;  %1403 = vmatpush1.msra.mxu0 %v1328_v37 }
0x12bf   :  { %1404 = vmatprep.subr.mxu0 %v1327_v4 }
0x12c0   :  { %1180 = vrot.lane.b32.xlu1 %v1174_v23, %s2978_s3  ;;  %1405 = vmatpush1.msra.mxu0 %v1326_v6 }
0x12c1   :  { %1406 = vmatprep.subr.mxu0 %v1325_v8 }
0x12c2   :  { %1407 = vmatpush1.msra.mxu0 %v1324_v10 }
0x12c3   :  { %2633 = vmatprep.subr.mxu0 %v2977_v0 }
0x1330   :  { %v3497_v47 = vpop.permute.xlu0 %1176 }
0x1332   :  { %v3499_v59 = vpop.permute.xlu1 %1180 }
0x1333   :  { %v1183_v39 = vsel %vm384_vm1, %v3497_v47, %v3499_v59  ;;  %v1313_v18 = vsel %vm384_vm1, %v3310_v56, %v3499_v59  ;;  %v1315_v56 = vsel %vm384_vm1, %v3396_v5, %v3440_v36  ;;  %v1318_v5 = vsel %vm384_vm1, %v3497_v47, %v3312_v25  ;;  %v3593_v36 = vld [vmem:[%s3785_s6] sm:$0x3] }
0x1334   :  { %2509 = vmatmul.mubr.msk.f32.vlgmr.msra.gmra.mxu1 %vm251_vm2, %v1183_v39 }
0x1335   :  { %2590 = vmatpush3.msra.mxu1 %v3515_v52  ;;  %2597 = vmatprep.mubr.msk.f32.mxu1 %vm2980_vm3, %v2977_v0 }
0x1336   :  { %2591 = vmatprep.subr.mxu1 %v2977_v0 }
0x1337   :  { %2592 = vmatpush3.msra.mxu1 %v3518_v58 }
0x1338   :  { %2593 = vmatprep.subr.mxu1 %v2977_v0 }
0x1339   :  { %2594 = vmatpush3.msra.mxu1 %v3521_v62 }
0x133a   :  { %2595 = vmatprep.subr.mxu1 %v2977_v0 }
0x133b   :  { %2596 = vmatpush3.msra.mxu1 %v3528_v11 }
0x133c   :  { %2600 = vmatprep.subr.mxu1 %v2977_v0  ;;  %2598 = vmatmul.mubr.f32.vlgmr.msra.gmra.mxu1 %v2977_v0 }
0x133d   :  { %2601 = vmatpush3.msra.mxu1 %v3515_v52  ;;  %2608 = vmatprep.mubr.msk.f32.mxu1 %vm2980_vm3, %v2977_v0 }
0x133e   :  { %2602 = vmatprep.subr.mxu1 %v2977_v0 }
0x133f   :  { %2603 = vmatpush3.msra.mxu1 %v3518_v58 }
0x1340   :  { %2604 = vmatprep.subr.mxu1 %v2977_v0 }
0x1341   :  { %2605 = vmatpush3.msra.mxu1 %v3521_v62 }
0x1342   :  { %2606 = vmatprep.subr.mxu1 %v2977_v0 }
0x1343   :  { %2607 = vmatpush3.msra.mxu1 %v3528_v11 }
0x1344   :  { %2611 = vmatprep.subr.mxu1 %v2977_v0 }
0x13f4   :  { %v1253_v41 = vpop.f32.mrf.mxu1 }
0x13f5   :  { %v3506_v40 = vadd.f32 %v1253_v41, %v3251_v9 }
0x13f6   :  { %v1255_v34 = vpop.f32.mrf.mxu1 }
0x13f7   :  { %v1259_v3 = vadd.f32 %v1255_v34, %v3225_v38 }
0x13f9   :  { %2820 = vtanh.f32 %v1259_v3  ;;  %v2511_v44 = vmul.f32 -1.442695, %v1259_v3 }
0x13fb   :  { %2822 = vpow2.f32 %v2511_v44 }
0x1406   :  { %v2821_v2 = vpop.eup %2820 }
0x1407   :  { %1293 = vrot.lane.b32.xlu0 %v2821_v2, %s2978_s3 }
0x1408   :  { %v2823_v43 = vpop.eup %2822 }
0x1409   :  { %v1287_v50 = vadd.f32 1.0, %v2823_v43 }
0x140b   :  { %2824 = vrcp.f32 %v1287_v50 }
0x1418   :  { %v3510_v61 = vpop.eup %2824 }
0x1419   :  { %v1291_v9 = vmul.f32 %v3510_v61, %v1168_v16 }
0x1479   :  { %v1294_v55 = vpop.permute.xlu0 %1293 }
0x147a   :  { %v1296_v57 = vmul.f32 %v3510_v61, %v1294_v55 }
0x147c   :  { %1298 = vrot.lane.b32.xlu1 %v1296_v57, %s2979_s1 }
0x14ee   :  { %v1299_v53 = vpop.permute.xlu1 %1298 }
0x14ef   :  { %v1301_v38 = vadd.f32 %v1299_v53, %v1291_v9 }
0x14f1   :  { %2826 = vtanh.f32 %v1301_v38 }
0x14fe   :  { %v2827_v42 = vpop.eup %2826 }
0x14ff   :  { %1304 = vrot.lane.b32.xlu0 %v2827_v42, %s2978_s3 }
0x1571   :  { %v1305_v13 = vpop.permute.xlu0 %1304 }
0x1572   :  { %v1307_v15 = vmul.f32 %v3510_v61, %v1305_v13 }
0x1574   :  { %1309 = vrot.lane.b32.xlu1 %v1307_v15, %s2978_s3 }
0x15e6   :  { %v1310_v16 = vpop.permute.xlu1 %1309 }
0x15e7   :  { %v1312_v17 = vsel %vm384_vm1, %v3267_v7, %v1310_v16  ;;  %v1314_v7 = vsel %vm384_vm1, %v3353_v60, %v3477_v46  ;;  %v1316_v60 = vsel %vm384_vm1, %v3438_v19, %v3398_v32  ;;  %v1317_v46 = vsel %vm384_vm1, %v3475_v45, %v3355_v28  ;;  %v1578_v32 = vpop.f32.mrf.mxu1 }
0x15e8   :  { %2512 = vmatmul.mubr.msk.f32.vlgmr.msra.gmra.mxu0 %vm251_vm2, %v1312_v17  ;;  %v3598_v28 = vrot.slane %v3593_v36, %v89_v33 }
0x15e9   :  { %1445 = vmatprep.mubr.f32.mxu0 %v2977_v0  ;;  %2634 = vmatpush3.msra.mxu0 %v3515_v52  ;;  %v2599_v19 = vpop.f32.mrf.mxu1 }
0x15ea   :  { %2635 = vmatprep.subr.mxu0 %v2977_v0 }
0x15eb   :  { %2636 = vmatpush3.msra.mxu0 %v3518_v58 }
0x15ec   :  { %2513 = vmatmul.mubr.msk.f32.gmra.mxu0 %vm251_vm2, %v1313_v18  ;;  %2637 = vmatprep.subr.mxu0 %v2977_v0 }
0x15ed   :  { %1450 = vmatprep.mubr.f32.mxu0 %v2977_v0  ;;  %2638 = vmatpush3.msra.mxu0 %v3521_v62 }
0x15ee   :  { %2639 = vmatprep.subr.mxu0 %v2977_v0 }
0x15ef   :  { %2640 = vmatpush3.msra.mxu0 %v3528_v11 }
0x15f0   :  { %2514 = vmatmul.mubr.msk.f32.gmra.mxu0 %vm251_vm2, %v1314_v7  ;;  %2655 = vmatprep.subr.mxu0 %v2977_v0 }
0x15f1   :  { %1455 = vmatprep.mubr.f32.mxu0 %v2977_v0 }
0x15f4   :  { %2515 = vmatmul.mubr.msk.f32.gmra.mxu0 %vm251_vm2, %v1315_v56 }
0x15f5   :  { %1460 = vmatprep.mubr.f32.mxu0 %v2977_v0 }
0x15f8   :  { %2516 = vmatmul.mubr.msk.f32.gmra.mxu0 %vm251_vm2, %v1316_v60 }
0x15f9   :  { %1465 = vmatprep.mubr.f32.mxu0 %v2977_v0 }
0x15fc   :  { %2517 = vmatmul.mubr.msk.f32.gmra.mxu0 %vm251_vm2, %v1317_v46 }
0x15fd   :  { %1470 = vmatprep.mubr.f32.mxu0 %v2977_v0 }
0x1600   :  { %2518 = vmatmul.mubr.msk.f32.gmra.mxu0 %vm251_vm2, %v1318_v5 }
0x1601   :  { %1475 = vmatprep.mubr.f32.mxu0 %v2977_v0 }
0x16a8   :  { %v1442_v45 = vpop.f32.mrf.mxu0 }
0x16a9   :  { %v1443_v20 = vadd.f32 %v1442_v45, %v3598_v28 }
0x16aa   :  { %v1444_v25 = vpop.f32.mrf.mxu0 }
0x16ab   :  { %v1582_v21 = vadd.f32 %v1578_v32, %v1443_v20 }
0x16ac   :  { %v1447_v22 = vpop.f32.mrf.mxu0 }
0x16ad   :  { %2828 = vtanh.f32 %v1582_v21  ;;  %v2521_v61 = vmul.f32 -1.442695, %v1582_v21  ;;  %v1448_v27 = vadd.f32 %v1447_v22, %v3598_v28 }
0x16ae   :  { %v1449_v23 = vpop.f32.mrf.mxu0 }
0x16af   :  { %2830 = vpow2.f32 %v2521_v61 }
0x16b0   :  { %v3601_v47 = vpop.f32.mrf.mxu0 }
0x16b1   :  { %v1453_v46 = vadd.f32 %v3601_v47, %v3598_v28 }
0x16b2   :  { %v1454_v59 = vpop.f32.mrf.mxu0 }
0x16b4   :  { %v3603_v39 = vpop.f32.mrf.mxu0 }
0x16b6   :  { %v1459_v41 = vpop.f32.mrf.mxu0 }
0x16b8   :  { %v3605_v34 = vpop.f32.mrf.mxu0 }
0x16ba   :  { %v2829_v3 = vpop.eup %2828  ;;  %v1464_v2 = vpop.f32.mrf.mxu0 }
0x16bb   :  { %1592 = vrot.lane.b32.xlu0 %v2829_v3, %s2978_s3 }
0x16bc   :  { %v3608_v33 = vpop.f32.mrf.mxu0  ;;  %v2831_v55 = vpop.eup %2830 }
0x16bd   :  { %v1586_v57 = vadd.f32 1.0, %v2831_v55 }
0x16be   :  { %v1469_v44 = vpop.f32.mrf.mxu0 }
0x16bf   :  { %2832 = vrcp.f32 %v1586_v57 }
0x16c0   :  { %v3610_v43 = vpop.f32.mrf.mxu0 }
0x16c2   :  { %v1474_v50 = vpop.f32.mrf.mxu0 }
0x16c3   :  { %v2510_v50 = vmul.f32 -1.442695, %v3506_v40 }
0x16cc   :  { %v2833_v9 = vpop.eup %2832 }
0x16cd   :  { %v1590_v48 = vmul.f32 0.0, %v2833_v9 }
0x172d   :  { %v1593_v53 = vpop.permute.xlu0 %1592 }
0x172e   :  { %v1595_v38 = vmul.f32 %v2833_v9, %v1593_v53 }
0x1730   :  { %1597 = vrot.lane.b32.xlu1 %v1595_v38, %s2979_s1 }
0x17a2   :  { %v1598_v51 = vpop.permute.xlu1 %1597 }
0x17a3   :  { %v1600_v54 = vadd.f32 %v1598_v51, %v1590_v48 }
0x17a5   :  { %2834 = vtanh.f32 %v1600_v54 }
0x17b2   :  { %v2835_v1 = vpop.eup %2834 }
0x17b3   :  { %1603 = vrot.lane.b32.xlu0 %v2835_v1, %s2978_s3 }
0x1825   :  { %v1604_v49 = vpop.permute.xlu0 %1603 }
0x1826   :  { %v1606_v24 = vmul.f32 %v2833_v9, %v1604_v49 }
0x1828   :  { %1608 = vrot.lane.b32.xlu1 %v1606_v24, %s2979_s1 }
0x189a   :  { %v1609_v26 = vpop.permute.xlu1 %1608 }
0x189b   :  { %2609 = vmatmul.mubr.msk.f32.vlgmr.msra.gmra.mxu1 %vm384_vm1, %v1609_v26  ;;  %v1458_v26 = vadd.f32 %v3603_v39, %v3598_v28 }
0x189c   :  { %2612 = vmatpush3.msra.mxu1 %v3515_v52  ;;  %2619 = vmatprep.mubr.msk.f32.mxu1 %vm2980_vm3, %v2977_v0 }
0x189d   :  { %2613 = vmatprep.subr.mxu1 %v2977_v0 }
0x189e   :  { %2614 = vmatpush3.msra.mxu1 %v3518_v58 }
0x189f   :  { %2615 = vmatprep.subr.mxu1 %v2977_v0 }
0x18a0   :  { %2616 = vmatpush3.msra.mxu1 %v3521_v62 }
0x18a1   :  { %2617 = vmatprep.subr.mxu1 %v2977_v0 }
0x18a2   :  { %2618 = vmatpush3.msra.mxu1 %v3528_v11 }
0x18a3   :  { %2622 = vmatprep.subr.mxu1 %v2977_v0 }
0x195b   :  { %v1678_v29 = vpop.f32.mrf.mxu1 }
0x195c   :  { %v1682_v35 = vadd.f32 %v1678_v29, %v1448_v27 }
0x195d   :  { %v2610_v63 = vpop.f32.mrf.mxu1 }
0x195e   :  { %2836 = vtanh.f32 %v1682_v35  ;;  %v2523_v42 = vmul.f32 -1.442695, %v1682_v35 }
0x1960   :  { %2838 = vpow2.f32 %v2523_v42 }
0x196b   :  { %v2837_v37 = vpop.eup %2836 }
0x196c   :  { %1692 = vrot.lane.b32.xlu0 %v2837_v37, %s2978_s3 }
0x196d   :  { %v2839_v4 = vpop.eup %2838 }
0x196e   :  { %v1686_v6 = vadd.f32 1.0, %v2839_v4 }
0x1970   :  { %2840 = vrcp.f32 %v1686_v6 }
0x197d   :  { %v2841_v8 = vpop.eup %2840 }
0x197e   :  { %v1690_v15 = vmul.f32 %v2841_v8, %v1600_v54 }
0x19de   :  { %v1693_v10 = vpop.permute.xlu0 %1692 }
0x19df   :  { %v1695_v13 = vmul.f32 %v2841_v8, %v1693_v10 }
0x19e1   :  { %1697 = vrot.lane.b32.xlu1 %v1695_v13, %s2979_s1 }
0x1a53   :  { %v1698_v16 = vpop.permute.xlu1 %1697 }
0x1a54   :  { %v1700_v17 = vadd.f32 %v1698_v16, %v1690_v15 }
0x1a56   :  { %2842 = vtanh.f32 %v1700_v17 }
0x1a63   :  { %v2843_v18 = vpop.eup %2842 }
0x1a64   :  { %1703 = vrot.lane.b32.xlu0 %v2843_v18, %s2978_s3 }
0x1ad6   :  { %v1704_v7 = vpop.permute.xlu0 %1703 }
0x1ad7   :  { %v1706_v56 = vmul.f32 %v2841_v8, %v1704_v7 }
0x1ad9   :  { %1708 = vrot.lane.b32.xlu1 %v1706_v56, %s2979_s1 }
0x1b4b   :  { %v1709_v60 = vpop.permute.xlu1 %1708 }
0x1b4c   :  { %2620 = vmatmul.mubr.msk.f32.vlgmr.msra.gmra.mxu1 %vm384_vm1, %v1709_v60 }
0x1b4d   :  { %2623 = vmatpush3.msra.mxu1 %v3515_v52  ;;  %2630 = vmatprep.mubr.msk.f32.mxu1 %vm2980_vm3, %v2977_v0 }
0x1b4e   :  { %2624 = vmatprep.subr.mxu1 %v2977_v0 }
0x1b4f   :  { %2625 = vmatpush3.msra.mxu1 %v3518_v58 }
0x1b50   :  { %2626 = vmatprep.subr.mxu1 %v2977_v0 }
0x1b51   :  { %2627 = vmatpush3.msra.mxu1 %v3521_v62 }
0x1b52   :  { %2628 = vmatprep.subr.mxu1 %v2977_v0 }
0x1b53   :  { %2629 = vmatpush3.msra.mxu1 %v3528_v11 }
0x1b54   :  { %2644 = vmatprep.subr.mxu1 %v2977_v0 }
0x1c0c   :  { %v1778_v5 = vpop.f32.mrf.mxu1 }
0x1c0d   :  { %v1782_v32 = vadd.f32 %v1778_v5, %v1453_v46  ;;  %v1463_v5 = vadd.f32 %v3605_v34, %v3598_v28 }
0x1c0e   :  { %v2621_v19 = vpop.f32.mrf.mxu1 }
0x1c0f   :  { %2844 = vtanh.f32 %v1782_v32  ;;  %v2525_v20 = vmul.f32 -1.442695, %v1782_v32 }
0x1c11   :  { %2846 = vpow2.f32 %v2525_v20 }
0x1c1c   :  { %v2845_v45 = vpop.eup %2844 }
0x1c1d   :  { %1792 = vrot.lane.b32.xlu0 %v2845_v45, %s2978_s3 }
0x1c1e   :  { %v2847_v25 = vpop.eup %2846 }
0x1c1f   :  { %v1786_v21 = vadd.f32 1.0, %v2847_v25 }
0x1c21   :  { %2848 = vrcp.f32 %v1786_v21 }
0x1c2e   :  { %v2849_v22 = vpop.eup %2848 }
0x1c2f   :  { %v1790_v41 = vmul.f32 %v2849_v22, %v1700_v17 }
0x1c8f   :  { %v1793_v23 = vpop.permute.xlu0 %1792 }
0x1c90   :  { %v1795_v59 = vmul.f32 %v2849_v22, %v1793_v23 }
0x1c92   :  { %1797 = vrot.lane.b32.xlu1 %v1795_v59, %s2979_s1 }
0x1d04   :  { %v1798_v3 = vpop.permute.xlu1 %1797 }
0x1d05   :  { %v1800_v47 = vadd.f32 %v1798_v3, %v1790_v41 }
0x1d07   :  { %2850 = vtanh.f32 %v1800_v47 }
0x1d08   :  { %2852 = vtanh.f32 %v3506_v40 }
0x1d09   :  { %2854 = vpow2.f32 %v2510_v50 }
0x1d14   :  { %v2851_v2 = vpop.eup %2850 }
0x1d15   :  { %1803 = vrot.lane.b32.xlu0 %v2851_v2, %s2978_s3  ;;  %v2853_v44 = vpop.eup %2852 }
0x1d16   :  { %v2855_v61 = vpop.eup %2854 }
0x1d17   :  { %v1263_v55 = vadd.f32 1.0, %v2855_v61 }
0x1d19   :  { %1269 = vrot.lane.b32.xlu0 %v2853_v44, %s2978_s3  ;;  %2856 = vrcp.f32 %v1263_v55 }
0x1d26   :  { %v2857_v53 = vpop.eup %2856 }
0x1d27   :  { %v1267_v40 = vmul.f32 %v2857_v53, %v3490_v12 }
0x1d87   :  { %v1804_v57 = vpop.permute.xlu0 %1803 }
0x1d88   :  { %v1806_v9 = vmul.f32 %v2849_v22, %v1804_v57 }
0x1d8a   :  { %1808 = vrot.lane.b32.xlu1 %v1806_v9, %s2979_s1 }
0x1d8b   :  { %v1270_v38 = vpop.permute.xlu0 %1269 }
0x1d8c   :  { %v1272_v48 = vmul.f32 %v2857_v53, %v1270_v38 }
0x1d8e   :  { %1274 = vrot.lane.b32.xlu0 %v1272_v48, %s2979_s1 }
0x1dfc   :  { %v1809_v51 = vpop.permute.xlu1 %1808 }
0x1dfd   :  { %2631 = vmatmul.mubr.msk.f32.vlgmr.msra.gmra.mxu1 %vm384_vm1, %v1809_v51 }
0x1dfe   :  { %2645 = vmatpush3.msra.mxu1 %v3515_v52  ;;  %2652 = vmatprep.mubr.msk.f32.mxu1 %vm2980_vm3, %v2977_v0 }
0x1dff   :  { %2646 = vmatprep.subr.mxu1 %v2977_v0 }
0x1e00   :  { %v1275_v54 = vpop.permute.xlu0 %1274  ;;  %2647 = vmatpush3.msra.mxu1 %v3518_v58 }
0x1e01   :  { %v1277_v1 = vadd.f32 %v1275_v54, %v1267_v40  ;;  %2648 = vmatprep.subr.mxu1 %v2977_v0 }
0x1e02   :  { %2649 = vmatpush3.msra.mxu1 %v3521_v62 }
0x1e03   :  { %2858 = vtanh.f32 %v1277_v1  ;;  %2650 = vmatprep.subr.mxu1 %v2977_v0 }
0x1e04   :  { %2651 = vmatpush3.msra.mxu1 %v3528_v11 }
0x1e05   :  { %2666 = vmatprep.subr.mxu1 %v2977_v0 }
0x1e10   :  { %v2859_v49 = vpop.eup %2858 }
0x1e11   :  { %1280 = vrot.lane.b32.xlu0 %v2859_v49, %s2978_s3 }
0x1e83   :  { %v1281_v12 = vpop.permute.xlu0 %1280 }
0x1e84   :  { %v1283_v24 = vmul.f32 %v2857_v53, %v1281_v12 }
0x1e86   :  { %1320 = vrot.lane.b32.xlu0 %v1283_v24, %s2979_s1 }
0x1ebd   :  { %v1878_v27 = vpop.f32.mrf.mxu1 }
0x1ebe   :  { %v1882_v29 = vadd.f32 %v1878_v27, %v1458_v26  ;;  %v1473_v26 = vadd.f32 %v3610_v43, %v3598_v28  ;;  %v1349_v43 = vrot.slane %v3593_v36, %v93_v31 }
0x1ebf   :  { %v2632_v35 = vpop.f32.mrf.mxu1 }
0x1ec0   :  { %2860 = vtanh.f32 %v1882_v29  ;;  %v2527_v4 = vmul.f32 -1.442695, %v1882_v29 }
0x1ec2   :  { %2862 = vpow2.f32 %v2527_v4 }
0x1ecd   :  { %v2861_v63 = vpop.eup %2860 }
0x1ece   :  { %1892 = vrot.lane.b32.xlu1 %v2861_v63, %s2978_s3 }
0x1ecf   :  { %v2863_v6 = vpop.eup %2862 }
0x1ed0   :  { %v1886_v39 = vadd.f32 1.0, %v2863_v6 }
0x1ed2   :  { %2864 = vrcp.f32 %v1886_v39 }
0x1edf   :  { %v2865_v8 = vpop.eup %2864 }
0x1ee0   :  { %v1890_v15 = vmul.f32 %v2865_v8, %v1800_v47 }
0x1ef8   :  { %v1321_v37 = vpop.permute.xlu0 %1320 }
0x1ef9   :  { %v1323_v42 = vsel %vm384_vm1, %v1321_v37, %v3269_v14 }
0x1efa   :  { %2519 = vmatmul.mubr.msk.f32.gmra.mxu0 %vm251_vm2, %v1323_v42 }
0x1efb   :  { %2641 = vmatprep.mubr.msk.f32.mxu0 %vm2980_vm3, %v2977_v0 }
0x1f40   :  { %v1893_v10 = vpop.permute.xlu1 %1892 }
0x1f41   :  { %v1895_v13 = vmul.f32 %v2865_v8, %v1893_v10 }
0x1f43   :  { %1897 = vrot.lane.b32.xlu1 %v1895_v13, %s2979_s1 }
0x1fb5   :  { %v1898_v16 = vpop.permute.xlu1 %1897 }
0x1fb6   :  { %v1900_v17 = vadd.f32 %v1898_v16, %v1890_v15 }
0x1fb8   :  { %2866 = vtanh.f32 %v1900_v17 }
0x1fba   :  { %v3688_v60 = vpop.f32.mrf.mxu0 }
0x1fbc   :  { %v3690_v46 = vpop.f32.mrf.mxu0 }
0x1fbd   :  { %v1480_v16 = vadd.f32 %v3690_v46, %v1349_v43 }
0x1fc5   :  { %v2867_v14 = vpop.eup %2866 }
0x1fc6   :  { %1903 = vrot.lane.b32.xlu1 %v2867_v14, %s2978_s3 }
0x2038   :  { %v1904_v18 = vpop.permute.xlu1 %1903 }
0x2039   :  { %v1906_v7 = vmul.f32 %v2865_v8, %v1904_v18  ;;  %v2520_v18 = vmul.f32 -1.442695, %v1480_v16 }
0x203b   :  { %1908 = vrot.lane.b32.xlu1 %v1906_v7, %s2979_s1 }
0x20ad   :  { %v1909_v56 = vpop.permute.xlu1 %1908 }
0x20ae   :  { %2642 = vmatmul.mubr.msk.f32.vlgmr.msra.gmra.mxu0 %vm384_vm1, %v1909_v56 }
0x20af   :  { %2656 = vmatpush3.msra.mxu0 %v3515_v52  ;;  %2663 = vmatprep.mubr.msk.f32.mxu0 %vm2980_vm3, %v2977_v0 }
0x20b0   :  { %2657 = vmatprep.subr.mxu0 %v2977_v0 }
0x20b1   :  { %2658 = vmatpush3.msra.mxu0 %v3518_v58 }
0x20b2   :  { %2659 = vmatprep.subr.mxu0 %v2977_v0 }
0x20b3   :  { %2660 = vmatpush3.msra.mxu0 %v3521_v62 }
0x20b4   :  { %2661 = vmatprep.subr.mxu0 %v2977_v0 }
0x20b5   :  { %2662 = vmatpush3.msra.mxu0 %v3528_v11 }
0x20b6   :  { %2677 = vmatprep.subr.mxu0 %v2977_v0 }
0x216e   :  { %v1978_v32 = vpop.f32.mrf.mxu0 }
0x216f   :  { %v1982_v19 = vadd.f32 %v1978_v32, %v1463_v5 }
0x2170   :  { %v2643_v45 = vpop.f32.mrf.mxu0 }
0x2171   :  { %2868 = vtanh.f32 %v1982_v19  ;;  %v2529_v25 = vmul.f32 -1.442695, %v1982_v19 }
0x2173   :  { %2870 = vpow2.f32 %v2529_v25 }
0x217e   :  { %v2869_v20 = vpop.eup %2868 }
0x217f   :  { %1992 = vrot.lane.b32.xlu0 %v2869_v20, %s2978_s3 }
0x2180   :  { %v2871_v21 = vpop.eup %2870 }
0x2181   :  { %v1986_v22 = vadd.f32 1.0, %v2871_v21  ;;  %v2314_v21 = vld [vmem:[%s3786_s7 + $0x38] sm:$0xff] }
0x2183   :  { %2872 = vrcp.f32 %v1986_v22  ;;  %v2313_v22 = vld [vmem:[%s3786_s7 + $0x30] sm:$0xff] }
0x2190   :  { %v2873_v23 = vpop.eup %2872 }
0x2191   :  { %v1990_v3 = vmul.f32 %v2873_v23, %v1900_v17 }
0x21f1   :  { %v1993_v59 = vpop.permute.xlu0 %1992 }
0x21f2   :  { %v1995_v41 = vmul.f32 %v2873_v23, %v1993_v59  ;;  %v2311_v59 = vld [vmem:[%s3786_s7 + $0x20] sm:$0xff] }
0x21f4   :  { %1997 = vrot.lane.b32.xlu1 %v1995_v41, %s2979_s1 }
0x2266   :  { %v1998_v47 = vpop.permute.xlu1 %1997 }
0x2267   :  { %v2000_v34 = vadd.f32 %v1998_v47, %v1990_v3  ;;  %v1478_v47 = vadd.f32 %v3688_v60, %v3598_v28 }
0x2269   :  { %2874 = vtanh.f32 %v2000_v34 }
0x2276   :  { %v2875_v2 = vpop.eup %2874 }
0x2277   :  { %2003 = vrot.lane.b32.xlu0 %v2875_v2, %s2978_s3 }
0x22e9   :  { %v2004_v44 = vpop.permute.xlu0 %2003 }
0x22ea   :  { %v2006_v50 = vmul.f32 %v2873_v23, %v2004_v44  ;;  %v2312_v23 = vld [vmem:[%s3786_s7 + $0x28] sm:$0xff] }
0x22ec   :  { %2008 = vrot.lane.b32.xlu1 %v2006_v50, %s2979_s1 }
0x235e   :  { %v2009_v61 = vpop.permute.xlu1 %2008 }
0x235f   :  { %2653 = vmatmul.mubr.msk.f32.vlgmr.msra.gmra.mxu1 %vm384_vm1, %v2009_v61 }
0x2360   :  { %2667 = vmatpush3.msra.mxu1 %v3515_v52  ;;  %2674 = vmatprep.mubr.msk.f32.mxu1 %vm2980_vm3, %v2977_v0  ;;  %v1468_v52 = vadd.f32 %v3608_v33, %v3598_v28 }
0x2361   :  { %2668 = vmatprep.subr.mxu1 %v2977_v0 }
0x2362   :  { %2669 = vmatpush3.msra.mxu1 %v3518_v58 }
0x2363   :  { %2670 = vmatprep.subr.mxu1 %v2977_v0 }
0x2364   :  { %2671 = vmatpush3.msra.mxu1 %v3521_v62 }
0x2365   :  { %2672 = vmatprep.subr.mxu1 %v2977_v0 }
0x2366   :  { %2673 = vmatpush3.msra.mxu1 %v3528_v11 }
0x2367   :  { %2688 = vmatprep.subr.mxu1 %v2977_v0 }
0x241f   :  { %v2078_v55 = vpop.f32.mrf.mxu1 }
0x2420   :  { %v2082_v57 = vadd.f32 %v2078_v55, %v1468_v52 }
0x2421   :  { %v2654_v9 = vpop.f32.mrf.mxu1 }
0x2422   :  { %2876 = vtanh.f32 %v2082_v57  ;;  %v2531_v58 = vmul.f32 -1.442695, %v2082_v57 }
0x2424   :  { %2878 = vpow2.f32 %v2531_v58 }
0x242f   :  { %v2877_v53 = vpop.eup %2876 }
0x2430   :  { %2092 = vrot.lane.b32.xlu0 %v2877_v53, %s2978_s3 }
0x2431   :  { %v2879_v38 = vpop.eup %2878 }
0x2432   :  { %v2086_v62 = vadd.f32 1.0, %v2879_v38 }
0x2434   :  { %2880 = vrcp.f32 %v2086_v62 }
0x2441   :  { %v2881_v48 = vpop.eup %2880 }
0x2442   :  { %v2090_v40 = vmul.f32 %v2881_v48, %v2000_v34 }
0x24a2   :  { %v2093_v51 = vpop.permute.xlu0 %2092 }
0x24a3   :  { %v2095_v11 = vmul.f32 %v2881_v48, %v2093_v51  ;;  %v2310_v51 = vld [vmem:[%s3786_s7 + $0x18] sm:$0xff] }
0x24a5   :  { %2097 = vrot.lane.b32.xlu1 %v2095_v11, %s2979_s1  ;;  %v2309_v11 = vld [vmem:[%s3786_s7 + $0x10] sm:$0xff] }
0x2517   :  { %v2098_v54 = vpop.permute.xlu1 %2097 }
0x2518   :  { %v2100_v33 = vadd.f32 %v2098_v54, %v2090_v40  ;;  %v2308_v40 = vld [vmem:[%s3786_s7 + $0x8] sm:$0xff]  ;;  %v2307_v54 = vld [vmem:[%s3786_s7] sm:$0xff] }
0x251a   :  { %2882 = vtanh.f32 %v2100_v33 }
0x2527   :  { %v2883_v1 = vpop.eup %2882 }
0x2528   :  { %2103 = vrot.lane.b32.xlu0 %v2883_v1, %s2978_s3 }
0x259a   :  { %v2104_v49 = vpop.permute.xlu0 %2103 }
0x259b   :  { %v2106_v12 = vmul.f32 %v2881_v48, %v2104_v49 }
0x259d   :  { %2108 = vrot.lane.b32.xlu1 %v2106_v12, %s2979_s1 }
0x260f   :  { %v2109_v24 = vpop.permute.xlu1 %2108 }
0x2610   :  { %2664 = vmatmul.mubr.msk.f32.vlgmr.msra.gmra.mxu0 %vm384_vm1, %v2109_v24 }
0x2611   :  { %2685 = vmatprep.mubr.msk.f32.mxu0 %vm2980_vm3, %v2977_v0  ;;  %2678 = vmatpush3.msra.mxu0 %v2314_v21 }
0x2612   :  { %2679 = vmatprep.subr.mxu0 %v2977_v0 }
0x2613   :  { %2680 = vmatpush3.msra.mxu0 %v2313_v22 }
0x2614   :  { %2681 = vmatprep.subr.mxu0 %v2977_v0 }
0x2615   :  { %2682 = vmatpush3.msra.mxu0 %v2312_v23 }
0x2616   :  { %2683 = vmatprep.subr.mxu0 %v2977_v0 }
0x2617   :  { %2684 = vmatpush3.msra.mxu0 %v2311_v59 }
0x26d0   :  { %v2178_v27 = vpop.f32.mrf.mxu0 }
0x26d1   :  { %v2182_v29 = vadd.f32 %v2178_v27, %v1473_v26  ;;  %v2538_v26 = vld [vmem:[%s3787_s8] ss:$0 sm:$0xff] }
0x26d2   :  { %v2665_v35 = vpop.f32.mrf.mxu0 }
0x26d3   :  { %2884 = vtanh.f32 %v2182_v29  ;;  %v2533_v37 = vmul.f32 -1.442695, %v2182_v29 }
0x26d5   :  { %2886 = vpow2.f32 %v2533_v37 }
0x26e0   :  { %v2885_v63 = vpop.eup %2884 }
0x26e1   :  { %2192 = vrot.lane.b32.xlu0 %v2885_v63, %s2978_s3 }
0x26e2   :  { %v2887_v42 = vpop.eup %2886 }
0x26e3   :  { %v2186_v4 = vadd.f32 1.0, %v2887_v42 }
0x26e5   :  { %2888 = vrcp.f32 %v2186_v4 }
0x26f2   :  { %v2889_v6 = vpop.eup %2888 }
0x26f3   :  { %v2190_v10 = vmul.f32 %v2889_v6, %v2100_v33 }
0x2753   :  { %v2193_v39 = vpop.permute.xlu0 %2192 }
0x2754   :  { %v2195_v8 = vmul.f32 %v2889_v6, %v2193_v39 }
0x2756   :  { %2197 = vrot.lane.b32.xlu1 %v2195_v8, %s2979_s1 }
0x27c8   :  { %v2198_v13 = vpop.permute.xlu1 %2197 }
0x27c9   :  { %v2200_v15 = vadd.f32 %v2198_v13, %v2190_v10 }
0x27cb   :  { %2890 = vtanh.f32 %v2200_v15 }
0x27cc   :  { %2892 = vtanh.f32 %v1480_v16 }
0x27cd   :  { %2894 = vpow2.f32 %v2520_v18 }
0x27d8   :  { %v2891_v17 = vpop.eup %2890 }
0x27d9   :  { %2203 = vrot.lane.b32.xlu0 %v2891_v17, %s2978_s3  ;;  %v2893_v14 = vpop.eup %2892 }
0x27da   :  { %v2895_v7 = vpop.eup %2894 }
0x27db   :  { %v1489_v56 = vadd.f32 1.0, %v2895_v7 }
0x27dd   :  { %1495 = vrot.lane.b32.xlu0 %v2893_v14, %s2978_s3  ;;  %2896 = vrcp.f32 %v1489_v56 }
0x27ea   :  { %v2897_v36 = vpop.eup %2896 }
0x27eb   :  { %v1493_v19 = vmul.f32 0.0, %v2897_v36 }
0x284b   :  { %v2204_v30 = vpop.permute.xlu0 %2203 }
0x284c   :  { %v2206_v31 = vmul.f32 %v2889_v6, %v2204_v30 }
0x284e   :  { %2208 = vrot.lane.b32.xlu1 %v2206_v31, %s2979_s1 }
0x284f   :  { %v1496_v5 = vpop.permute.xlu0 %1495 }
0x2850   :  { %v1498_v46 = vmul.f32 %v2897_v36, %v1496_v5 }
0x2852   :  { %1500 = vrot.lane.b32.xlu0 %v1498_v46, %s2979_s1 }
0x28c0   :  { %v2209_v32 = vpop.permute.xlu1 %2208 }
0x28c1   :  { %2675 = vmatmul.mubr.msk.f32.vlgmr.msra.gmra.mxu1 %vm384_vm1, %v2209_v32 }
0x28c2   :  { %2696 = vmatprep.mubr.msk.f32.mxu1 %vm2980_vm3, %v2977_v0  ;;  %2689 = vmatpush3.msra.mxu1 %v2310_v51 }
0x28c3   :  { %2690 = vmatprep.subr.mxu1 %v2977_v0 }
0x28c4   :  { %v1501_v45 = vpop.permute.xlu0 %1500  ;;  %2691 = vmatpush3.msra.mxu1 %v2309_v11 }
0x28c5   :  { %v1503_v20 = vadd.f32 %v1501_v45, %v1493_v19  ;;  %2692 = vmatprep.subr.mxu1 %v2977_v0 }
0x28c6   :  { %2693 = vmatpush3.msra.mxu1 %v2308_v40 }
0x28c7   :  { %2898 = vtanh.f32 %v1503_v20  ;;  %2694 = vmatprep.subr.mxu1 %v2977_v0 }
0x28c8   :  { %2695 = vmatpush3.msra.mxu1 %v2307_v54 }
0x28d4   :  { %v2899_v25 = vpop.eup %2898 }
0x28d5   :  { %1506 = vrot.lane.b32.xlu0 %v2899_v25, %s2978_s3 }
0x2947   :  { %v1507_v41 = vpop.permute.xlu0 %1506 }
0x2948   :  { %v1509_v3 = vmul.f32 %v2897_v36, %v1507_v41 }
0x294a   :  { %2316 = vrot.lane.b32.xlu0 %v1509_v3, %s2979_s1 }
0x2981   :  { %v2278_v34 = vpop.f32.mrf.mxu1 }
0x2982   :  { %v2282_v2 = vadd.f32 %v2278_v34, %v1478_v47 }
0x2983   :  { %v2676_v44 = vpop.f32.mrf.mxu1 }
0x2984   :  { %2900 = vtanh.f32 %v2282_v2  ;;  %v2535_v52 = vmul.f32 -1.442695, %v2282_v2 }
0x2986   :  { %2902 = vpow2.f32 %v2535_v52 }
0x2991   :  { %v2901_v50 = vpop.eup %2900 }
0x2992   :  { %2292 = vrot.lane.b32.xlu1 %v2901_v50, %s2978_s3 }
0x2993   :  { %v2903_v55 = vpop.eup %2902 }
0x2994   :  { %v2286_v57 = vadd.f32 1.0, %v2903_v55 }
0x2996   :  { %2904 = vrcp.f32 %v2286_v57 }
0x29a3   :  { %v2905_v9 = vpop.eup %2904 }
0x29a4   :  { %v2290_v28 = vmul.f32 %v2905_v9, %v2200_v15 }
0x29bc   :  { %v2317_v61 = vpop.permute.xlu0 %2316 }
0x29bd   :  { %2686 = vmatmul.mubr.msk.f32.vlgmr.msra.gmra.mxu0 %vm384_vm1, %v2317_v61 }
0x2a04   :  { %v2293_v53 = vpop.permute.xlu1 %2292 }
0x2a05   :  { %v2295_v58 = vmul.f32 %v2905_v9, %v2293_v53 }
0x2a07   :  { %2297 = vrot.lane.b32.xlu1 %v2295_v58, %s2979_s1 }
0x2a79   :  { %v2298_v60 = vpop.permute.xlu1 %2297 }
0x2a7a   :  { %v2300_v38 = vadd.f32 %v2298_v60, %v2290_v28 }
0x2a7c   :  { %2906 = vtanh.f32 %v2300_v38 }
0x2a7d   :  { %v2386_v62 = vpop.f32.mrf.mxu0 }
0x2a7f   :  { %v2687_v48 = vpop.f32.mrf.mxu0 }
0x2a89   :  { %v2907_v33 = vpop.eup %2906 }
0x2a8a   :  { %2303 = vrot.lane.b32.xlu1 %v2907_v33, %s2978_s3 }
0x2afc   :  { %v2304_v1 = vpop.permute.xlu1 %2303 }
0x2afd   :  { %v2306_v49 = vmul.f32 %v2905_v9, %v2304_v1 }
0x2aff   :  { %2391 = vrot.lane.b32.xlu1 %v2306_v49, %s2979_s1 }
0x2b71   :  { %v2392_v12 = vpop.permute.xlu1 %2391 }
0x2b72   :  { %2697 = vmatmul.mubr.msk.f32.vlgmr.msra.gmra.mxu1 %vm384_vm1, %v2392_v12 }
0x2c32   :  { %v2461_v24 = vpop.f32.mrf.mxu1 }
0x2c33   :  { %v2462_v27 = vadd.f32 %v2461_v24, %v2386_v62 }
0x2c34   :  { %v2698_v29 = vpop.f32.mrf.mxu1 }
0x2c35   :  { %v2472_v0 = vadd.f32 %v2538_v26, %v2462_v27 }
0x2c37   :  { %2474 = vst.msk [vmem:[%s3788_s9] sm:$0xff] %vm2473_vm4, %v2472_v0 }
0x2c38   :  { %2479 = vsyncpa [#allocation3], 1 }
0x2c39   :  { %2480 = vsyncpa [#allocation5], 1 }

</bundles_post_ra>
